<compile_context>
chip_gen: v7x
topology: tpu7x:2x2x1
jax: 0.10.0
libtpu: 0.0.40
codegen_flags: <defaults>
</compile_context>

<pallas_src>
import jax
import jax.numpy as jnp
from jax.experimental import pallas as pl
from jax.experimental.pallas import tpu as pltpu


def _bias_kernel(alpha_ref, beta_ref, x_ref, o_ref):
    # alpha_ref / beta_ref: (1,) f32 scalars in SMEM; x_ref / o_ref: VMEM tiles.
    a = alpha_ref[0]
    b = beta_ref[0]
    o_ref[...] = (a * x_ref[...].astype(jnp.float32) + b).astype(o_ref.dtype)


# Block-row granularity: multiple of the sublane tile for every dtype we may
# see (f32: 8, bf16: 16, int8/fp8: 32) so block offsets stay tile-aligned.
_ROW_GRANULARITY = 32


def _bias_2d(x2d, alpha32, beta32, out_dtype, target_block_bytes, donate_x):
    """Runs y = alpha*x + beta on a lane-dense 2D slab (rows, lane)."""
    rows, lane = x2d.shape
    in_isize = jnp.dtype(x2d.dtype).itemsize
    out_isize = jnp.dtype(out_dtype).itemsize
    isize = max(in_isize, out_isize)

    g = _ROW_GRANULARITY
    if rows <= g:
        # Block covers the full sublane extent (allowed: equals the array dim).
        tr = rows
    else:
        tr = target_block_bytes // (lane * isize)
        tr = max(g, (min(tr, rows) // g) * g)
        # Guarantee >= 2 grid steps: keeps both v7x TensorCores fed and gives
        # the pipeline something to overlap. No-op on 1-TC v5e/v6e.
        half_cap = max(g, (((rows + 1) // 2 + g - 1) // g) * g)
        tr = min(tr, half_cap)

    grid = (pl.cdiv(rows, tr),)

    # Alias x -> output only when the buffers are byte-compatible and the
    # caller explicitly donated x (otherwise XLA would insert a defensive copy).
    aliases = {2: 0} if (donate_x and x2d.dtype == jnp.dtype(out_dtype)) else {}

    return pl.pallas_call(
        _bias_kernel,
        out_shape=jax.ShapeDtypeStruct((rows, lane), out_dtype),
        grid_spec=pltpu.PrefetchScalarGridSpec(
            num_scalar_prefetch=0,
            grid=grid,
            in_specs=[
                pl.BlockSpec(memory_space=pltpu.MemorySpace.SMEM),  # alpha (1,) f32
                pl.BlockSpec(memory_space=pltpu.MemorySpace.SMEM),  # beta  (1,) f32
                pl.BlockSpec((tr, lane), lambda i: (i, 0)),
            ],
            out_specs=pl.BlockSpec((tr, lane), lambda i: (i, 0)),
        ),
        compiler_params=pltpu.CompilerParams(
            # "parallel" lets the row axis shard across TensorCores on v7x
            # (serial loop on 1-TC v5e/v6e, where it is a no-op).
            dimension_semantics=("parallel",),
            # 4x 8-MiB double-buffered slabs = 32 MiB, plus headroom; fits
            # v5e/v6e (128 MiB physical) and v7x (64 MiB physical).
            vmem_limit_bytes=40 << 20,
        ),
        input_output_aliases=aliases,
    )(alpha32, beta32, x2d)


def bias_layer_forward(x, alpha, beta, *,
                       target_block_bytes=8 << 20,
                       small_bytes_threshold=2 << 20,
                       donate_x=False):
    """Applies y = alpha * x + beta elementwise (BiasLayer.forward).

    x: any-shape array (e.g. NCHW). alpha, beta: shape-(1,) float parameters.
    Output dtype follows PyTorch promotion against the float32 parameters
    (half/bf16/int inputs -> float32 output; float32 input -> float32).
    """
    orig_shape = x.shape
    out_dtype = jnp.promote_types(x.dtype, jnp.float32)

    alpha32 = jnp.asarray(alpha).reshape(-1).astype(jnp.float32)
    beta32 = jnp.asarray(beta).reshape(-1).astype(jnp.float32)

    def _jax_path(arr):
        return (alpha32[0] * arr.astype(jnp.float32) + beta32[0]).astype(out_dtype)

    flat = x.reshape(-1)
    n = flat.shape[0]
    bytes_moved = n * max(jnp.dtype(x.dtype).itemsize, jnp.dtype(out_dtype).itemsize)

    # Small-tensor bypass: a single-block grid has no pipelining and only adds
    # launch overhead; XLA's fused elementwise op is already at roofline.
    if n == 0 or bytes_moved < small_bytes_threshold:
        return _jax_path(x)

    # Pick the widest lane width that divides n (free reshape, no pad/slice
    # copies; lane-dense unmasked stores).
    lane = None
    for cand in (2048, 1024, 512, 256, 128):
        if n % cand == 0:
            lane = cand
            break

    if lane is None:
        # Ragged size: one fused plain-JAX affine (already HBM-bound; avoids
        # the old kernel-prefix + tail + concatenate double-write).
        return _jax_path(x)

    rows = n // lane
    out2d = _bias_2d(flat.reshape(rows, lane), alpha32, beta32, out_dtype,
                     target_block_bytes, donate_x)
    return out2d.reshape(orig_shape)


if __name__ == "__main__":
    key = jax.random.PRNGKey(0)
    k1, k2, k3, k4 = jax.random.split(key, 4)

    # Deterministic parameter init matching BiasLayer.__init__:
    #   alpha = ones(1), beta = zeros(1)
    alpha = jnp.ones((1,), dtype=jnp.float32)
    beta = jnp.zeros((1,), dtype=jnp.float32)

    # Small NCHW feature map (small-tensor bypass path).
    x_small = jax.random.normal(k1, (2, 4, 16, 16), dtype=jnp.float32)
    y_small = jax.block_until_ready(bias_layer_forward(x_small, alpha, beta))
    assert y_small.shape == x_small.shape and y_small.dtype == jnp.float32
    assert jnp.allclose(y_small, alpha[0] * x_small + beta[0], atol=1e-6, rtol=1e-6)

    # Non-trivial params, medium NCHW map: Pallas kernel path with a
    # multi-step grid and a partial boundary block (rows=360, tr=192, grid=2).
    alpha2 = jnp.full((1,), 1.5, dtype=jnp.float32)
    beta2 = jnp.full((1,), -0.25, dtype=jnp.float32)
    x_med = jax.random.normal(k2, (4, 32, 72, 80), dtype=jnp.float32)
    y_med = jax.block_until_ready(bias_layer_forward(x_med, alpha2, beta2))
    assert y_med.dtype == jnp.float32
    assert jnp.allclose(y_med, alpha2[0] * x_med + beta2[0], atol=1e-5, rtol=1e-5)

    # bf16 input: float32 parameters promote the output to float32 (matches
    # PyTorch promotion); still runs through the kernel path.
    x_bf = jax.random.normal(k3, (4, 32, 72, 80), dtype=jnp.bfloat16)
    y_bf = jax.block_until_ready(bias_layer_forward(x_bf, alpha2, beta2))
    assert y_bf.dtype == jnp.float32
    ref_bf = alpha2[0] * x_bf.astype(jnp.float32) + beta2[0]
    assert jnp.allclose(y_bf, ref_bf, atol=1e-5, rtol=1e-5)

    # Ragged size (not a multiple of 128): fused plain-JAX fallback, no
    # concatenate round-trip.
    x_rag = jax.random.normal(k4, (2, 3, 50), dtype=jnp.float32)
    y_rag = jax.block_until_ready(bias_layer_forward(x_rag, alpha2, beta2))
    assert jnp.allclose(y_rag, alpha2[0] * x_rag + beta2[0], atol=1e-6, rtol=1e-6)

    print("KERNEL_OK")
</pallas_src>

<mosaic_0001>
module attributes {stable_mosaic.version = 11 : i64} {
  func.func @_bias_kernel(%arg0: i32, %arg1: memref<1xf32, #tpu.memory_space<smem>>, %arg2: memref<1xf32, #tpu.memory_space<smem>>, %arg3: memref<192x2048xf32, #tpu.memory_space<vmem>>, %arg4: memref<192x2048xf32, #tpu.memory_space<vmem>>) attributes {dimension_semantics = [#tpu.dimension_semantics<parallel>], iteration_bounds = array<i64: 2>, scalar_prefetch = 0 : i64, scratch_operands = 0 : i64, tpu.core_type = #tpu.core_type<tc>, window_params = [{transform_indices = @transform_0, window_bounds = array<i64: 1>}, {transform_indices = @transform_1, window_bounds = array<i64: 1>}, {transform_indices = @transform_2, window_bounds = array<i64: 192, 2048>}, {transform_indices = @transform_3, window_bounds = array<i64: 192, 2048>}]} {
    %c0 = arith.constant 0 : index
    %0 = memref.load %arg1[%c0] : memref<1xf32, #tpu.memory_space<smem>>
    %c0_0 = arith.constant 0 : index
    %1 = memref.load %arg2[%c0_0] : memref<1xf32, #tpu.memory_space<smem>>
    %c0_1 = arith.constant 0 : index
    %c0_2 = arith.constant 0 : index
    %2 = vector.load %arg3[%c0_1, %c0_2] : memref<192x2048xf32, #tpu.memory_space<vmem>>, vector<192x2048xf32>
    %3 = vector.broadcast %0 : f32 to vector<192x2048xf32>
    %4 = arith.mulf %3, %2 : vector<192x2048xf32>
    %5 = vector.broadcast %1 : f32 to vector<192x2048xf32>
    %6 = arith.addf %4, %5 : vector<192x2048xf32>
    %c0_3 = arith.constant 0 : index
    %c0_4 = arith.constant 0 : index
    %7 = vector.load %arg4[%c0_3, %c0_4] : memref<192x2048xf32, #tpu.memory_space<vmem>>, vector<192x2048xf32>
    tpu.vector_store %arg4[%c0_3, %c0_4], %6 {strides = array<i32>} : memref<192x2048xf32, #tpu.memory_space<vmem>>, vector<192x2048xf32>,
    return
  }
  func.func @transform_0(%arg0: i32) -> i32 {
    %c0_i32 = arith.constant 0 : i32
    %c0_i32_0 = arith.constant 0 : i32
    return %c0_i32 : i32
  }
  func.func @transform_1(%arg0: i32) -> i32 {
    %c0_i32 = arith.constant 0 : i32
    %c0_i32_0 = arith.constant 0 : i32
    return %c0_i32 : i32
  }
  func.func @transform_2(%arg0: i32) -> (i32, i32) {
    %c0_i32 = arith.constant 0 : i32
    %c0_i32_0 = arith.constant 0 : i32
    return %arg0, %c0_i32 : i32, i32
  }
  func.func @transform_3(%arg0: i32) -> (i32, i32) {
    %c0_i32 = arith.constant 0 : i32
    %c0_i32_0 = arith.constant 0 : i32
    return %arg0, %c0_i32 : i32, i32
  }
}

</mosaic_0001>

<bundles_post_ra>
// kernel: tpu_custom_call.1
= control target key start
LH: loop header
LB: loop body
LE: loop exit
PB: predicated region body
PF: predicated region fallthrough
CT: control target
= control target key end

     0   :  { %s3766_s0 = inlined_call_operand.<no memory space> [shape: f32[1], index: 0, kind: input, shape index: {}]   ;;  %s3767_s1 = inlined_call_operand.<no memory space> [shape: f32[1], index: 1, kind: input, shape index: {}]   ;;  %s3768_s2 = inlined_call_operand.hbm [shape: f32[360,2048], index: 2, kind: input, shape index: {}]   ;;  %s3769_s3 = inlined_call_operand.hbm [shape: f32[360,2048], index: 3, kind: output, shape index: {}]  }
   0x1   :  { %8 = sst [smem:[#allocation2]] %s3766_s0 }
   0x2   :  { %9 = sst [smem:[#allocation3]] %s3767_s1 }
   0x3   :  { %10 = vsyncpa [#allocation5], 0 }
   0x4   :  { %12 = vsyncpa [#allocation5 + $0x1], 0 }
   0x5   :  { %13 = vsyncpa [#allocation6], 0 }
   0x6   :  { %15 = vsyncpa [#allocation6 + $0x1], 0  ;;  %s2047_s16 = smov 0   ;;  %s2049_s17 = smov 0  }
   0x7   :  { %s2051_s18 = smov 0   ;;  %s2053_s19 = smov 0  }
   0x8 LB: > { %s2068_s0 = sadd.s32 4294967295, %s2013_s19   ;;  %s1846_s1 = sadd.s32 4294967294, %s2013_s19   ;;  %s2013_s19 = sphi %s2053_s19, %s3779_s19   ;;  %s2009_s18 = sphi %s2051_s18, %s3778_s18   ;;  %s2005_s17 = sphi %s2049_s17, %s3777_s17   ;;  %s2001_s16 = sphi %s2047_s16, %s3776_s16  }
   0x9   : > { %s2072_s20 = sadd.s32 1, %s2013_s19   ;;  %s70_s21 = sadd.s32 1, %s2009_s18 }
   0xa   : > { %s67_s22 = ssub.s32 %s2013_s19, %s2072_s20  ;;  %p77_p0 = scmp.ne.s32.totalorder %s2009_s18, %s2005_s17 }
   0xb   : > { %p68_p1 = scmp.eq.s32.totalorder %s67_s22, 0  ;;  %p78_p2 = scmp.eq.s32.totalorder %s2013_s19, 0 }
   0xc   : > { %p83_p3 = scmp.ne.s32.totalorder %s2005_s17, %s2001_s16  ;;  %p84_p4 = scmp.eq.s32.totalorder %s2068_s0, 0 }
   0xd   : > { %s2084_s23 = scalar_select %p68_p1, %s2009_s18, %s70_s21  }
   0xe   : > { %p79_p5 = por %p78_p2, %p77_p0  ;;  %p2086_p6 = por %p84_p4, %p83_p3 }
   0xf   : > { %p107_p7 = scmp.eq.s32.totalorder %s2068_s0, 1  ;;  %p113_p8 = scmp.eq.s32.totalorder %s1846_s1, 1 }
  0x10   : > { %p3770_p11 = scmp.ge.s32.totalorder %s2013_s19, 2 }
  0x11   : > { %p2091_p9 = por %p107_p7, %p77_p0  ;;  %p2095_p10 = por %p113_p8, %p83_p3 }
  0x12   : > { %135 = sbr.rel (%p3770_p11) target bundleno = 60 (0x3c), region = 24 }
  0x13   : > { %s3773_s26 = scalar_select %p2095_p10, 1, 0 }
  0x19   : > { %138 = sbr.rel (!%p79_p5) target bundleno = 60 (0x3c), region = 28  ;;  %s139_s27 = sand.u32 (%p79_p5), 1, %s2009_s18  }
  0x1a   : > { %s144_s28 = smul.u32 (%p79_p5), 24, %s2013_s19  ;;  %s2107_s6 = scalar_lea.sflag (%p79_p5), [#allocation5], %s139_s27 }
  0x1b   : > { %s1874_s29 = smul.u32 (%p79_p5), 3072, %s139_s27 }
  0x1c   : > { %s145_s30 = ssub.s32 (%p79_p5), 45, %s144_s28 }
  0x1d   : > { %p146_p12 = scmp.lt.s32.totalorder (%p79_p5), %s145_s30, 24  ;;  %s143_s7 = scalar_lea.vmem (%p79_p5), [#allocation4], %s1874_s29 }
  0x20   : > { %s3781_s30 = smov (!%p146_p12, %s145_s30), 24 }
  0x21   : > { %s2104_s4 = sshll.u32 %s3781_s30, 11 }
  0x22   : > { %s151_s5 = ssub.s32 49152, %s2104_s4 }
  0x23   : > { %152 = vsyncadd %s2107_s6, %s151_s5  ;;  %p1851_p13 = scmp.ne.s32.totalorder %s2104_s4, 0  ;;  %s1872_s8 = smul.u32 49152, %s2013_s19 }
  0x24   : > { %s158_s9 = sshll.u32 %s143_s7, 4  ;;  %s1923_s1 = scalar_lea.hbm %s3768_s2, 92160  ;;  %s2117_s9 = int_to_ptr.vmem [resolvable:$true] %s158_s9 }
  0x25   : > { %s2115_s12 = scalar_lea.hbm %s3768_s2, %s1872_s8 }
  0x26   : > { %s1919_s13 = scalar_lea.hbm %s2115_s12, %s2104_s4  ;;  %p1924_p3 = scmp.lt.u32.totalorder %s2115_s12, %s3768_s2 }
  0x27   : > { %p1920_p0 = scmp.ne.s32.totalorder %s2115_s12, %s1919_s13  ;;  %p1925_p4 = scmp.lt.u32.totalorder %s1923_s1, %s1919_s13 }
  0x28   : > { %p1927_p7 = scmp.lt.u32.totalorder %s1919_s13, %s2115_s12 }
  0x29   : > { %p1921_p1 = pnand %p1920_p0, %p1851_p13  ;;  %p1926_p5 = por %p1925_p4, %p1924_p3 }
  0x2b   : > { %p1922_p2 = pneg %p1921_p1  ;;  %p1928_p8 = por %p1927_p7, %p1926_p5 }
  0x2d   : > { %p1929_p12 = pnand %p1928_p8, %p1922_p2 }
  0x2f   : > { %1932 = shalt.err (!%p1929_p12)
}
  0x30   : > { %s1933_s27 = scalar_lea.vmem %s2117_s9, %s2104_s4  ;;  %s2015_s28 = smov [#allocation4]  }
  0x31   : > { %p1934_p0 = scmp.ne.s32.totalorder %s2117_s9, %s1933_s27  ;;  %s1937_s29 = sshll.u32 %s2015_s28, 4  ;;  %s1938_s29 = int_to_ptr.vmem [resolvable:$false] %s1937_s29 }
  0x32   : > { %s1939_s30 = scalar_lea.vmem %s1938_s29, 98304  ;;  %p1940_p10 = scmp.lt.s32.totalorder %s2117_s9, %s1938_s29 }
  0x33   : > { %p1935_p1 = pnand %p1934_p0, %p1851_p13  ;;  %p1941_p3 = scmp.lt.s32.totalorder %s1939_s30, %s1933_s27 }
  0x35   : > { %p1936_p11 = pneg %p1935_p1  ;;  %p1942_p4 = por %p1941_p3, %p1940_p10 }
  0x37   : > { %p1943_p5 = pnand %p1942_p4, %p1936_p11 }
  0x39   : > { %1946 = shalt.err (!%p1943_p5)
}
  0x3a   : > { %s2016_s5 = smov 2048   ;;  %s2017_s7 = smov 128  }
  0x3b   : > { %164 = dma.hbm_to_vmem [thread:$0]  (%p1851_p13), %s2115_s12, %s2104_s4, %s2117_s9, %s2107_s6, %s2016_s5, %s2016_s5, %s2017_s7  }
  0x3c PF: > { %p1856_p2 = scmp.ge.s32.totalorder %s2013_s19, 1  ;;  %p166_p7 = scmp.lt.s32.totalorder %s2013_s19, 3 }
  0x3e   : > { %p167_p8 = pnand %p1856_p2, %p166_p7 }
  0x3f   : > { %s2147_s8 = sand.u32 (!%p167_p8), 1, %s2005_s17  }
  0x40   : > { %170 = sbr.rel (%p167_p8) target bundleno = 341 (0x155), region = 32  ;;  %s173_s11 = scalar_lea.sflag (!%p167_p8), [#allocation5], %s2147_s8 }
  0x41   : > { %s1875_s10 = smul.u32 (!%p167_p8), 3072, %s2147_s8 }
  0x43   : > { %s2153_s13 = scalar_lea.vmem (!%p167_p8), [#allocation4], %s1875_s10 }
  0x47   : > { %1992 = dma.done.wait (%p2086_p6), %s173_s11, 49152  }
  0x48   : > { %1994 = vsyncadd (%p2086_p6), %s173_s11, 4294918144  ;;  %s211_s4 = sld [smem:[#allocation2]]  ;;  %v213_v0 = vld [vmem:[%s2153_s13] sm:$0xff]  ;;  %v214_v3 = vld [vmem:[%s2153_s13 + $0x8] sm:$0xff]  ;;  %s2192_s24 = scalar_lea.vmem [#allocation7], %s1875_s10 }
  0x49   : > { %s212_s6 = sld [smem:[#allocation3]]  ;;  %v215_v6 = vld [vmem:[%s2153_s13 + $0x10] sm:$0xff]  ;;  %v216_v7 = vld [vmem:[%s2153_s13 + $0x18] sm:$0xff]  ;;  %v217_v8 = vld [vmem:[%s2153_s13 + $0x20] sm:$0xff]  ;;  %s1752_s9 = scalar_lea.sflag [#allocation6], %s2147_s8 }
  0x4a   : > { %v218_v12 = vld [vmem:[%s2153_s13 + $0x28] sm:$0xff]  ;;  %v219_v13 = vld [vmem:[%s2153_s13 + $0x30] sm:$0xff]  ;;  %v220_v14 = vld [vmem:[%s2153_s13 + $0x38] sm:$0xff]  ;;  %s1759_s12 = smul.u32 (%p2091_p9), 24, %s2068_s0 }
  0x4b   : > { %v221_v19 = vld [vmem:[%s2153_s13 + $0x40] sm:$0xff]  ;;  %v222_v20 = vld [vmem:[%s2153_s13 + $0x48] sm:$0xff]  ;;  %v223_v21 = vld [vmem:[%s2153_s13 + $0x50] sm:$0xff] }
  0x4c   : > { %v224_v26 = vld [vmem:[%s2153_s13 + $0x58] sm:$0xff]  ;;  %v225_v27 = vld [vmem:[%s2153_s13 + $0x60] sm:$0xff]  ;;  %v226_v28 = vld [vmem:[%s2153_s13 + $0x68] sm:$0xff]  ;;  %s1760_s14 = ssub.s32 (%p2091_p9), 45, %s1759_s12 }
  0x4d   : > { %v227_v33 = vld [vmem:[%s2153_s13 + $0x70] sm:$0xff]  ;;  %v228_v34 = vld [vmem:[%s2153_s13 + $0x78] sm:$0xff]  ;;  %v229_v39 = vld [vmem:[%s2153_s13 + $0x80] sm:$0xff]  ;;  %p1761_p6 = scmp.lt.s32.totalorder (%p2091_p9), %s1760_s14, 24 }
  0x4e   : > { %v2160_v1 = vstv %s211_s4  ;;  %v230_v40 = vld [vmem:[%s2153_s13 + $0x88] sm:$0xff]  ;;  %v231_v45 = vld [vmem:[%s2153_s13 + $0x90] sm:$0xff]  ;;  %v232_v46 = vld [vmem:[%s2153_s13 + $0x98] sm:$0xff] }
  0x4f   : > { %v2162_v2 = vstv %s212_s6  ;;  %v598_v4 = vmul.f32 %v2160_v1, %v213_v0  ;;  %v599_v5 = vmul.f32 %v2160_v1, %v214_v3  ;;  %v600_v9 = vmul.f32 %v2160_v1, %v215_v6  ;;  %v233_v47 = vld [vmem:[%s2153_s13 + $0xa0] sm:$0xff]  ;;  %v234_v52 = vld [vmem:[%s2153_s13 + $0xa8] sm:$0xff]  ;;  %v235_v53 = vld [vmem:[%s2153_s13 + $0xb0] sm:$0xff] }
  0x50   : > { %v601_v10 = vmul.f32 %v2160_v1, %v216_v7  ;;  %v602_v11 = vmul.f32 %v2160_v1, %v217_v8  ;;  %v603_v17 = vmul.f32 %v2160_v1, %v218_v12  ;;  %v604_v18 = vmul.f32 %v2160_v1, %v219_v13  ;;  %v236_v58 = vld [vmem:[%s2153_s13 + $0xb8] sm:$0xff]  ;;  %v237_v63 = vld [vmem:[%s2153_s13 + $0xc0] sm:$0xff]  ;;  %v238_v0 = vld [vmem:[%s2153_s13 + $0xc8] sm:$0xff] }
  0x51   : > { %v983_v15 = vadd.f32 %v2162_v2, %v598_v4  ;;  %v984_v16 = vadd.f32 %v2162_v2, %v599_v5  ;;  %v985_v22 = vadd.f32 %v2162_v2, %v600_v9  ;;  %v605_v25 = vmul.f32 %v2160_v1, %v220_v14  ;;  %v239_v7 = vld [vmem:[%s2153_s13 + $0xd0] sm:$0xff]  ;;  %v240_v8 = vld [vmem:[%s2153_s13 + $0xd8] sm:$0xff]  ;;  %v241_v9 = vld [vmem:[%s2153_s13 + $0xe0] sm:$0xff] }
  0x52   : > { %v986_v23 = vadd.f32 %v2162_v2, %v601_v10  ;;  %v987_v24 = vadd.f32 %v2162_v2, %v602_v11  ;;  %v988_v29 = vadd.f32 %v2162_v2, %v603_v17  ;;  %v989_v30 = vadd.f32 %v2162_v2, %v604_v18  ;;  %v242_v14 = vld [vmem:[%s2153_s13 + $0xe8] sm:$0xff] }
  0x53   : > { %1367 = vst [vmem:[%s2192_s24] sm:$0xff] %v983_v15  ;;  %1368 = vst [vmem:[%s2192_s24 + $0x8] sm:$0xff] %v984_v16  ;;  %v606_v31 = vmul.f32 %v2160_v1, %v221_v19  ;;  %v607_v32 = vmul.f32 %v2160_v1, %v222_v20  ;;  %v990_v35 = vadd.f32 %v2162_v2, %v605_v25  ;;  %v243_v15 = vld [vmem:[%s2153_s13 + $0xf0] sm:$0xff]  ;;  %v244_v20 = vld [vmem:[%s2153_s13 + $0xf8] sm:$0xff] }
  0x54   : > { %1369 = vst [vmem:[%s2192_s24 + $0x10] sm:$0xff] %v985_v22  ;;  %1370 = vst [vmem:[%s2192_s24 + $0x18] sm:$0xff] %v986_v23  ;;  %v608_v36 = vmul.f32 %v2160_v1, %v223_v21  ;;  %v609_v37 = vmul.f32 %v2160_v1, %v224_v26  ;;  %v610_v38 = vmul.f32 %v2160_v1, %v225_v27  ;;  %v245_v25 = vld [vmem:[%s2153_s13 + $0x100] sm:$0xff]  ;;  %v246_v26 = vld [vmem:[%s2153_s13 + $0x108] sm:$0xff] }
  0x55   : > { %1371 = vst [vmem:[%s2192_s24 + $0x20] sm:$0xff] %v987_v24  ;;  %1372 = vst [vmem:[%s2192_s24 + $0x28] sm:$0xff] %v988_v29  ;;  %v991_v41 = vadd.f32 %v2162_v2, %v606_v31  ;;  %v992_v42 = vadd.f32 %v2162_v2, %v607_v32  ;;  %v611_v43 = vmul.f32 %v2160_v1, %v226_v28  ;;  %v247_v31 = vld [vmem:[%s2153_s13 + $0x110] sm:$0xff]  ;;  %v248_v32 = vld [vmem:[%s2153_s13 + $0x118] sm:$0xff] }
  0x56   : > { %1373 = vst [vmem:[%s2192_s24 + $0x30] sm:$0xff] %v989_v30  ;;  %v612_v44 = vmul.f32 %v2160_v1, %v227_v33  ;;  %1374 = vst [vmem:[%s2192_s24 + $0x38] sm:$0xff] %v990_v35  ;;  %v993_v48 = vadd.f32 %v2162_v2, %v608_v36  ;;  %v994_v49 = vadd.f32 %v2162_v2, %v609_v37  ;;  %v249_v33 = vld [vmem:[%s2153_s13 + $0x120] sm:$0xff] }
  0x57   : > { %v995_v50 = vadd.f32 %v2162_v2, %v610_v38  ;;  %v613_v51 = vmul.f32 %v2160_v1, %v228_v34  ;;  %1375 = vst [vmem:[%s2192_s24 + $0x40] sm:$0xff] %v991_v41  ;;  %1376 = vst [vmem:[%s2192_s24 + $0x48] sm:$0xff] %v992_v42  ;;  %v996_v54 = vadd.f32 %v2162_v2, %v611_v43  ;;  %v250_v38 = vld [vmem:[%s2153_s13 + $0x128] sm:$0xff] }
  0x58   : > { %v997_v55 = vadd.f32 %v2162_v2, %v612_v44  ;;  %v614_v56 = vmul.f32 %v2160_v1, %v229_v39  ;;  %v615_v57 = vmul.f32 %v2160_v1, %v230_v40  ;;  %1377 = vst [vmem:[%s2192_s24 + $0x50] sm:$0xff] %v993_v48  ;;  %1378 = vst [vmem:[%s2192_s24 + $0x58] sm:$0xff] %v994_v49  ;;  %v251_v39 = vld [vmem:[%s2153_s13 + $0x130] sm:$0xff]  ;;  %v252_v44 = vld [vmem:[%s2153_s13 + $0x138] sm:$0xff] }
  0x59   : > { %1379 = vst [vmem:[%s2192_s24 + $0x60] sm:$0xff] %v995_v50  ;;  %v998_v59 = vadd.f32 %v2162_v2, %v613_v51  ;;  %v616_v60 = vmul.f32 %v2160_v1, %v231_v45  ;;  %v617_v61 = vmul.f32 %v2160_v1, %v232_v46  ;;  %v618_v62 = vmul.f32 %v2160_v1, %v233_v47  ;;  %v253_v49 = vld [vmem:[%s2153_s13 + $0x140] sm:$0xff]  ;;  %v254_v50 = vld [vmem:[%s2153_s13 + $0x148] sm:$0xff] }
  0x5a   : > { %1380 = vst [vmem:[%s2192_s24 + $0x68] sm:$0xff] %v996_v54  ;;  %1381 = vst [vmem:[%s2192_s24 + $0x70] sm:$0xff] %v997_v55  ;;  %v999_v3 = vadd.f32 %v2162_v2, %v614_v56  ;;  %v1000_v4 = vadd.f32 %v2162_v2, %v615_v57  ;;  %v619_v5 = vmul.f32 %v2160_v1, %v234_v52  ;;  %v255_v55 = vld [vmem:[%s2153_s13 + $0x150] sm:$0xff]  ;;  %v256_v56 = vld [vmem:[%s2153_s13 + $0x158] sm:$0xff] }
  0x5b   : > { %v620_v6 = vmul.f32 %v2160_v1, %v235_v53  ;;  %1382 = vst [vmem:[%s2192_s24 + $0x78] sm:$0xff] %v998_v59  ;;  %v1001_v10 = vadd.f32 %v2162_v2, %v616_v60  ;;  %v1002_v11 = vadd.f32 %v2162_v2, %v617_v61  ;;  %v1003_v12 = vadd.f32 %v2162_v2, %v618_v62  ;;  %v257_v57 = vld [vmem:[%s2153_s13 + $0x160] sm:$0xff]  ;;  %v258_v62 = vld [vmem:[%s2153_s13 + $0x168] sm:$0xff] }
  0x5c   : > { %v621_v13 = vmul.f32 %v2160_v1, %v236_v58  ;;  %1383 = vst [vmem:[%s2192_s24 + $0x80] sm:$0xff] %v999_v3  ;;  %1384 = vst [vmem:[%s2192_s24 + $0x88] sm:$0xff] %v1000_v4  ;;  %v1004_v16 = vadd.f32 %v2162_v2, %v619_v5  ;;  %v622_v18 = vmul.f32 %v2160_v1, %v237_v63  ;;  %v259_v63 = vld [vmem:[%s2153_s13 + $0x170] sm:$0xff] }
  0x5d   : > { %v1005_v17 = vadd.f32 %v2162_v2, %v620_v6  ;;  %v623_v19 = vmul.f32 %v2160_v1, %v238_v0  ;;  %1385 = vst [vmem:[%s2192_s24 + $0x90] sm:$0xff] %v1001_v10  ;;  %1386 = vst [vmem:[%s2192_s24 + $0x98] sm:$0xff] %v1002_v11  ;;  %v624_v22 = vmul.f32 %v2160_v1, %v239_v7  ;;  %v260_v6 = vld [vmem:[%s2153_s13 + $0x178] sm:$0xff]  ;;  %v261_v11 = vld [vmem:[%s2153_s13 + $0x180] sm:$0xff] }
  0x5e   : > { %1387 = vst [vmem:[%s2192_s24 + $0xa0] sm:$0xff] %v1003_v12  ;;  %v1006_v21 = vadd.f32 %v2162_v2, %v621_v13  ;;  %v625_v23 = vmul.f32 %v2160_v1, %v240_v8  ;;  %v626_v24 = vmul.f32 %v2160_v1, %v241_v9  ;;  %1388 = vst [vmem:[%s2192_s24 + $0xa8] sm:$0xff] %v1004_v16  ;;  %v262_v12 = vld [vmem:[%s2153_s13 + $0x188] sm:$0xff] }
  0x5f   : > { %1389 = vst [vmem:[%s2192_s24 + $0xb0] sm:$0xff] %v1005_v17  ;;  %v1007_v27 = vadd.f32 %v2162_v2, %v622_v18  ;;  %v1008_v28 = vadd.f32 %v2162_v2, %v623_v19  ;;  %v627_v29 = vmul.f32 %v2160_v1, %v242_v14  ;;  %v628_v30 = vmul.f32 %v2160_v1, %v243_v15  ;;  %v263_v17 = vld [vmem:[%s2153_s13 + $0x190] sm:$0xff]  ;;  %v264_v18 = vld [vmem:[%s2153_s13 + $0x198] sm:$0xff]  ;;  %v265_v19 = vld [vmem:[%s2153_s13 + $0x1a0] sm:$0xff] }
  0x60   : > { %1390 = vst [vmem:[%s2192_s24 + $0xb8] sm:$0xff] %v1006_v21  ;;  %v1009_v34 = vadd.f32 %v2162_v2, %v624_v22  ;;  %v1010_v35 = vadd.f32 %v2162_v2, %v625_v23  ;;  %v1011_v36 = vadd.f32 %v2162_v2, %v626_v24  ;;  %v629_v37 = vmul.f32 %v2160_v1, %v244_v20  ;;  %v266_v24 = vld [vmem:[%s2153_s13 + $0x1a8] sm:$0xff] }
  0x61   : > { %1391 = vst [vmem:[%s2192_s24 + $0xc0] sm:$0xff] %v1007_v27  ;;  %1392 = vst [vmem:[%s2192_s24 + $0xc8] sm:$0xff] %v1008_v28  ;;  %v1012_v40 = vadd.f32 %v2162_v2, %v627_v29  ;;  %v1013_v41 = vadd.f32 %v2162_v2, %v628_v30  ;;  %v630_v42 = vmul.f32 %v2160_v1, %v245_v25  ;;  %v267_v25 = vld [vmem:[%s2153_s13 + $0x1b0] sm:$0xff]  ;;  %v268_v30 = vld [vmem:[%s2153_s13 + $0x1b8] sm:$0xff] }
  0x62   : > { %v631_v43 = vmul.f32 %v2160_v1, %v246_v26  ;;  %1393 = vst [vmem:[%s2192_s24 + $0xd0] sm:$0xff] %v1009_v34  ;;  %1394 = vst [vmem:[%s2192_s24 + $0xd8] sm:$0xff] %v1010_v35  ;;  %v1014_v45 = vadd.f32 %v2162_v2, %v629_v37  ;;  %v632_v46 = vmul.f32 %v2160_v1, %v247_v31  ;;  %v269_v35 = vld [vmem:[%s2153_s13 + $0x1c0] sm:$0xff] }
  0x63   : > { %1395 = vst [vmem:[%s2192_s24 + $0xe0] sm:$0xff] %v1011_v36  ;;  %v633_v47 = vmul.f32 %v2160_v1, %v248_v32  ;;  %v634_v48 = vmul.f32 %v2160_v1, %v249_v33  ;;  %1396 = vst [vmem:[%s2192_s24 + $0xe8] sm:$0xff] %v1012_v40  ;;  %v1015_v51 = vadd.f32 %v2162_v2, %v630_v42  ;;  %v270_v36 = vld [vmem:[%s2153_s13 + $0x1c8] sm:$0xff]  ;;  %v272_v42 = vld [vmem:[%s2153_s13 + $0x1d8] sm:$0xff] }
  0x64   : > { %1397 = vst [vmem:[%s2192_s24 + $0xf0] sm:$0xff] %v1013_v41  ;;  %v1016_v52 = vadd.f32 %v2162_v2, %v631_v43  ;;  %v635_v53 = vmul.f32 %v2160_v1, %v250_v38  ;;  %v636_v54 = vmul.f32 %v2160_v1, %v251_v39  ;;  %1398 = vst [vmem:[%s2192_s24 + $0xf8] sm:$0xff] %v1014_v45  ;;  %v271_v41 = vld [vmem:[%s2153_s13 + $0x1d0] sm:$0xff]  ;;  %v273_v43 = vld [vmem:[%s2153_s13 + $0x1e0] sm:$0xff] }
  0x65   : > { %v1017_v58 = vadd.f32 %v2162_v2, %v632_v46  ;;  %v1018_v59 = vadd.f32 %v2162_v2, %v633_v47  ;;  %v1019_v60 = vadd.f32 %v2162_v2, %v634_v48  ;;  %v637_v61 = vmul.f32 %v2160_v1, %v252_v44  ;;  %1399 = vst [vmem:[%s2192_s24 + $0x100] sm:$0xff] %v1015_v51  ;;  %v274_v48 = vld [vmem:[%s2153_s13 + $0x1e8] sm:$0xff] }
  0x66   : > { %1400 = vst [vmem:[%s2192_s24 + $0x108] sm:$0xff] %v1016_v52  ;;  %v1020_v0 = vadd.f32 %v2162_v2, %v635_v53  ;;  %v1021_v3 = vadd.f32 %v2162_v2, %v636_v54  ;;  %v638_v4 = vmul.f32 %v2160_v1, %v253_v49  ;;  %v639_v5 = vmul.f32 %v2160_v1, %v254_v50  ;;  %v275_v49 = vld [vmem:[%s2153_s13 + $0x1f0] sm:$0xff]  ;;  %v276_v54 = vld [vmem:[%s2153_s13 + $0x1f8] sm:$0xff] }
  0x67   : > { %1401 = vst [vmem:[%s2192_s24 + $0x110] sm:$0xff] %v1017_v58  ;;  %1402 = vst [vmem:[%s2192_s24 + $0x118] sm:$0xff] %v1018_v59  ;;  %v1022_v7 = vadd.f32 %v2162_v2, %v637_v61  ;;  %v640_v8 = vmul.f32 %v2160_v1, %v255_v55  ;;  %v641_v9 = vmul.f32 %v2160_v1, %v256_v56  ;;  %v277_v59 = vld [vmem:[%s2153_s13 + $0x200] sm:$0xff] }
  0x68   : > { %1403 = vst [vmem:[%s2192_s24 + $0x120] sm:$0xff] %v1019_v60  ;;  %v642_v10 = vmul.f32 %v2160_v1, %v257_v57  ;;  %1404 = vst [vmem:[%s2192_s24 + $0x128] sm:$0xff] %v1020_v0  ;;  %v1023_v13 = vadd.f32 %v2162_v2, %v638_v4  ;;  %v1024_v14 = vadd.f32 %v2162_v2, %v639_v5  ;;  %v278_v60 = vld [vmem:[%s2153_s13 + $0x208] sm:$0xff]  ;;  %v280_v4 = vld [vmem:[%s2153_s13 + $0x218] sm:$0xff] }
  0x69   : > { %1405 = vst [vmem:[%s2192_s24 + $0x130] sm:$0xff] %v1021_v3  ;;  %v643_v15 = vmul.f32 %v2160_v1, %v258_v62  ;;  %v644_v16 = vmul.f32 %v2160_v1, %v259_v63  ;;  %1406 = vst [vmem:[%s2192_s24 + $0x138] sm:$0xff] %v1022_v7  ;;  %v1025_v20 = vadd.f32 %v2162_v2, %v640_v8  ;;  %v279_v3 = vld [vmem:[%s2153_s13 + $0x210] sm:$0xff]  ;;  %v281_v5 = vld [vmem:[%s2153_s13 + $0x220] sm:$0xff] }
  0x6a   : > { %v1026_v21 = vadd.f32 %v2162_v2, %v641_v9  ;;  %v1027_v22 = vadd.f32 %v2162_v2, %v642_v10  ;;  %v645_v23 = vmul.f32 %v2160_v1, %v260_v6  ;;  %1407 = vst [vmem:[%s2192_s24 + $0x140] sm:$0xff] %v1023_v13  ;;  %1408 = vst [vmem:[%s2192_s24 + $0x148] sm:$0xff] %v1024_v14  ;;  %v282_v10 = vld [vmem:[%s2153_s13 + $0x228] sm:$0xff] }
  0x6b   : > { %v1028_v26 = vadd.f32 %v2162_v2, %v643_v15  ;;  %v1029_v27 = vadd.f32 %v2162_v2, %v644_v16  ;;  %v646_v28 = vmul.f32 %v2160_v1, %v261_v11  ;;  %v647_v29 = vmul.f32 %v2160_v1, %v262_v12  ;;  %1409 = vst [vmem:[%s2192_s24 + $0x150] sm:$0xff] %v1025_v20  ;;  %v283_v11 = vld [vmem:[%s2153_s13 + $0x230] sm:$0xff]  ;;  %v284_v16 = vld [vmem:[%s2153_s13 + $0x238] sm:$0xff] }
  0x6c   : > { %1410 = vst [vmem:[%s2192_s24 + $0x158] sm:$0xff] %v1026_v21  ;;  %1411 = vst [vmem:[%s2192_s24 + $0x160] sm:$0xff] %v1027_v22  ;;  %v1030_v31 = vadd.f32 %v2162_v2, %v645_v23  ;;  %v648_v32 = vmul.f32 %v2160_v1, %v263_v17  ;;  %v649_v33 = vmul.f32 %v2160_v1, %v264_v18  ;;  %v285_v21 = vld [vmem:[%s2153_s13 + $0x240] sm:$0xff]  ;;  %v286_v22 = vld [vmem:[%s2153_s13 + $0x248] sm:$0xff] }
  0x6d   : > { %v650_v34 = vmul.f32 %v2160_v1, %v265_v19  ;;  %1412 = vst [vmem:[%s2192_s24 + $0x168] sm:$0xff] %v1028_v26  ;;  %1413 = vst [vmem:[%s2192_s24 + $0x170] sm:$0xff] %v1029_v27  ;;  %v1031_v37 = vadd.f32 %v2162_v2, %v646_v28  ;;  %v1032_v38 = vadd.f32 %v2162_v2, %v647_v29  ;;  %v287_v27 = vld [vmem:[%s2153_s13 + $0x250] sm:$0xff]  ;;  %v288_v28 = vld [vmem:[%s2153_s13 + $0x258] sm:$0xff] }
  0x6e   : > { %v651_v39 = vmul.f32 %v2160_v1, %v266_v24  ;;  %v652_v40 = vmul.f32 %v2160_v1, %v267_v25  ;;  %1414 = vst [vmem:[%s2192_s24 + $0x178] sm:$0xff] %v1030_v31  ;;  %v1033_v44 = vadd.f32 %v2162_v2, %v648_v32  ;;  %v1034_v45 = vadd.f32 %v2162_v2, %v649_v33  ;;  %v289_v29 = vld [vmem:[%s2153_s13 + $0x260] sm:$0xff] }
  0x6f   : > { %v1035_v46 = vadd.f32 %v2162_v2, %v650_v34  ;;  %v653_v47 = vmul.f32 %v2160_v1, %v268_v30  ;;  %1415 = vst [vmem:[%s2192_s24 + $0x180] sm:$0xff] %v1031_v37  ;;  %1416 = vst [vmem:[%s2192_s24 + $0x188] sm:$0xff] %v1032_v38  ;;  %v654_v52 = vmul.f32 %v2160_v1, %v269_v35  ;;  %v290_v34 = vld [vmem:[%s2153_s13 + $0x268] sm:$0xff]  ;;  %v291_v35 = vld [vmem:[%s2153_s13 + $0x270] sm:$0xff] }
  0x70   : > { %v1036_v50 = vadd.f32 %v2162_v2, %v651_v39  ;;  %v1037_v51 = vadd.f32 %v2162_v2, %v652_v40  ;;  %v655_v53 = vmul.f32 %v2160_v1, %v270_v36  ;;  %1417 = vst [vmem:[%s2192_s24 + $0x190] sm:$0xff] %v1033_v44  ;;  %1418 = vst [vmem:[%s2192_s24 + $0x198] sm:$0xff] %v1034_v45  ;;  %v292_v40 = vld [vmem:[%s2153_s13 + $0x278] sm:$0xff]  ;;  %v293_v45 = vld [vmem:[%s2153_s13 + $0x280] sm:$0xff] }
  0x71   : > { %1419 = vst [vmem:[%s2192_s24 + $0x1a0] sm:$0xff] %v1035_v46  ;;  %v1038_v55 = vadd.f32 %v2162_v2, %v653_v47  ;;  %v656_v56 = vmul.f32 %v2160_v1, %v271_v41  ;;  %v657_v57 = vmul.f32 %v2160_v1, %v272_v42  ;;  %v658_v58 = vmul.f32 %v2160_v1, %v273_v43  ;;  %v294_v46 = vld [vmem:[%s2153_s13 + $0x288] sm:$0xff] }
  0x72   : > { %1420 = vst [vmem:[%s2192_s24 + $0x1a8] sm:$0xff] %v1036_v50  ;;  %1421 = vst [vmem:[%s2192_s24 + $0x1b0] sm:$0xff] %v1037_v51  ;;  %v1039_v61 = vadd.f32 %v2162_v2, %v654_v52  ;;  %v1040_v62 = vadd.f32 %v2162_v2, %v655_v53  ;;  %v659_v63 = vmul.f32 %v2160_v1, %v274_v48  ;;  %v295_v51 = vld [vmem:[%s2153_s13 + $0x290] sm:$0xff]  ;;  %v296_v52 = vld [vmem:[%s2153_s13 + $0x298] sm:$0xff] }
  0x73   : > { %v660_v0 = vmul.f32 %v2160_v1, %v275_v49  ;;  %1422 = vst [vmem:[%s2192_s24 + $0x1b8] sm:$0xff] %v1038_v55  ;;  %v1041_v6 = vadd.f32 %v2162_v2, %v656_v56  ;;  %v1042_v7 = vadd.f32 %v2162_v2, %v657_v57  ;;  %v1043_v8 = vadd.f32 %v2162_v2, %v658_v58  ;;  %v297_v53 = vld [vmem:[%s2153_s13 + $0x2a0] sm:$0xff]  ;;  %v298_v58 = vld [vmem:[%s2153_s13 + $0x2a8] sm:$0xff] }
  0x74   : > { %v661_v9 = vmul.f32 %v2160_v1, %v276_v54  ;;  %1423 = vst [vmem:[%s2192_s24 + $0x1c0] sm:$0xff] %v1039_v61  ;;  %1424 = vst [vmem:[%s2192_s24 + $0x1c8] sm:$0xff] %v1040_v62  ;;  %v1044_v12 = vadd.f32 %v2162_v2, %v659_v63  ;;  %v662_v14 = vmul.f32 %v2160_v1, %v277_v59  ;;  %v299_v59 = vld [vmem:[%s2153_s13 + $0x2b0] sm:$0xff] }
  0x75   : > { %v1045_v13 = vadd.f32 %v2162_v2, %v660_v0  ;;  %v663_v15 = vmul.f32 %v2160_v1, %v278_v60  ;;  %1425 = vst [vmem:[%s2192_s24 + $0x1d0] sm:$0xff] %v1041_v6  ;;  %1426 = vst [vmem:[%s2192_s24 + $0x1d8] sm:$0xff] %v1042_v7  ;;  %v664_v18 = vmul.f32 %v2160_v1, %v279_v3  ;;  %v300_v0 = vld [vmem:[%s2153_s13 + $0x2b8] sm:$0xff]  ;;  %v301_v7 = vld [vmem:[%s2153_s13 + $0x2c0] sm:$0xff] }
  0x76   : > { %1427 = vst [vmem:[%s2192_s24 + $0x1e0] sm:$0xff] %v1043_v8  ;;  %v1046_v17 = vadd.f32 %v2162_v2, %v661_v9  ;;  %v665_v19 = vmul.f32 %v2160_v1, %v280_v4  ;;  %v666_v20 = vmul.f32 %v2160_v1, %v281_v5  ;;  %1428 = vst [vmem:[%s2192_s24 + $0x1e8] sm:$0xff] %v1044_v12  ;;  %v302_v8 = vld [vmem:[%s2153_s13 + $0x2c8] sm:$0xff] }
  0x77   : > { %1429 = vst [vmem:[%s2192_s24 + $0x1f0] sm:$0xff] %v1045_v13  ;;  %v1047_v23 = vadd.f32 %v2162_v2, %v662_v14  ;;  %v1048_v24 = vadd.f32 %v2162_v2, %v663_v15  ;;  %v667_v25 = vmul.f32 %v2160_v1, %v282_v10  ;;  %v668_v26 = vmul.f32 %v2160_v1, %v283_v11  ;;  %v303_v13 = vld [vmem:[%s2153_s13 + $0x2d0] sm:$0xff]  ;;  %v304_v14 = vld [vmem:[%s2153_s13 + $0x2d8] sm:$0xff]  ;;  %v305_v15 = vld [vmem:[%s2153_s13 + $0x2e0] sm:$0xff] }
  0x78   : > { %1430 = vst [vmem:[%s2192_s24 + $0x1f8] sm:$0xff] %v1046_v17  ;;  %v1049_v30 = vadd.f32 %v2162_v2, %v664_v18  ;;  %v1050_v31 = vadd.f32 %v2162_v2, %v665_v19  ;;  %v1051_v32 = vadd.f32 %v2162_v2, %v666_v20  ;;  %v669_v33 = vmul.f32 %v2160_v1, %v284_v16  ;;  %v306_v20 = vld [vmem:[%s2153_s13 + $0x2e8] sm:$0xff] }
  0x79   : > { %1431 = vst [vmem:[%s2192_s24 + $0x200] sm:$0xff] %v1047_v23  ;;  %1432 = vst [vmem:[%s2192_s24 + $0x208] sm:$0xff] %v1048_v24  ;;  %v1052_v36 = vadd.f32 %v2162_v2, %v667_v25  ;;  %v1053_v37 = vadd.f32 %v2162_v2, %v668_v26  ;;  %v670_v38 = vmul.f32 %v2160_v1, %v285_v21  ;;  %v307_v21 = vld [vmem:[%s2153_s13 + $0x2f0] sm:$0xff]  ;;  %v308_v26 = vld [vmem:[%s2153_s13 + $0x2f8] sm:$0xff] }
  0x7a   : > { %v671_v39 = vmul.f32 %v2160_v1, %v286_v22  ;;  %1433 = vst [vmem:[%s2192_s24 + $0x210] sm:$0xff] %v1049_v30  ;;  %1434 = vst [vmem:[%s2192_s24 + $0x218] sm:$0xff] %v1050_v31  ;;  %v1054_v41 = vadd.f32 %v2162_v2, %v669_v33  ;;  %v672_v42 = vmul.f32 %v2160_v1, %v287_v27  ;;  %v309_v31 = vld [vmem:[%s2153_s13 + $0x300] sm:$0xff] }
  0x7b   : > { %1435 = vst [vmem:[%s2192_s24 + $0x220] sm:$0xff] %v1051_v32  ;;  %v673_v43 = vmul.f32 %v2160_v1, %v288_v28  ;;  %v674_v44 = vmul.f32 %v2160_v1, %v289_v29  ;;  %1436 = vst [vmem:[%s2192_s24 + $0x228] sm:$0xff] %v1052_v36  ;;  %v1055_v47 = vadd.f32 %v2162_v2, %v670_v38  ;;  %v310_v32 = vld [vmem:[%s2153_s13 + $0x308] sm:$0xff]  ;;  %v312_v38 = vld [vmem:[%s2153_s13 + $0x318] sm:$0xff] }
  0x7c   : > { %1437 = vst [vmem:[%s2192_s24 + $0x230] sm:$0xff] %v1053_v37  ;;  %v1056_v48 = vadd.f32 %v2162_v2, %v671_v39  ;;  %v675_v49 = vmul.f32 %v2160_v1, %v290_v34  ;;  %v676_v50 = vmul.f32 %v2160_v1, %v291_v35  ;;  %1438 = vst [vmem:[%s2192_s24 + $0x238] sm:$0xff] %v1054_v41  ;;  %v311_v37 = vld [vmem:[%s2153_s13 + $0x310] sm:$0xff]  ;;  %v313_v39 = vld [vmem:[%s2153_s13 + $0x320] sm:$0xff] }
  0x7d   : > { %v1057_v54 = vadd.f32 %v2162_v2, %v672_v42  ;;  %v1058_v55 = vadd.f32 %v2162_v2, %v673_v43  ;;  %v1059_v56 = vadd.f32 %v2162_v2, %v674_v44  ;;  %v677_v57 = vmul.f32 %v2160_v1, %v292_v40  ;;  %1439 = vst [vmem:[%s2192_s24 + $0x240] sm:$0xff] %v1055_v47  ;;  %v314_v44 = vld [vmem:[%s2153_s13 + $0x328] sm:$0xff] }
  0x7e   : > { %1440 = vst [vmem:[%s2192_s24 + $0x248] sm:$0xff] %v1056_v48  ;;  %v1060_v60 = vadd.f32 %v2162_v2, %v675_v49  ;;  %v1061_v61 = vadd.f32 %v2162_v2, %v676_v50  ;;  %v678_v62 = vmul.f32 %v2160_v1, %v293_v45  ;;  %v679_v63 = vmul.f32 %v2160_v1, %v294_v46  ;;  %v315_v45 = vld [vmem:[%s2153_s13 + $0x330] sm:$0xff]  ;;  %v316_v50 = vld [vmem:[%s2153_s13 + $0x338] sm:$0xff] }
  0x7f   : > { %1441 = vst [vmem:[%s2192_s24 + $0x250] sm:$0xff] %v1057_v54  ;;  %1442 = vst [vmem:[%s2192_s24 + $0x258] sm:$0xff] %v1058_v55  ;;  %v1062_v3 = vadd.f32 %v2162_v2, %v677_v57  ;;  %v680_v4 = vmul.f32 %v2160_v1, %v295_v51  ;;  %v681_v5 = vmul.f32 %v2160_v1, %v296_v52  ;;  %v317_v55 = vld [vmem:[%s2153_s13 + $0x340] sm:$0xff] }
  0x80   : > { %1443 = vst [vmem:[%s2192_s24 + $0x260] sm:$0xff] %v1059_v56  ;;  %v682_v6 = vmul.f32 %v2160_v1, %v297_v53  ;;  %1444 = vst [vmem:[%s2192_s24 + $0x268] sm:$0xff] %v1060_v60  ;;  %v1063_v9 = vadd.f32 %v2162_v2, %v678_v62  ;;  %v1064_v10 = vadd.f32 %v2162_v2, %v679_v63  ;;  %v318_v56 = vld [vmem:[%s2153_s13 + $0x348] sm:$0xff]  ;;  %v320_v62 = vld [vmem:[%s2153_s13 + $0x358] sm:$0xff] }
  0x81   : > { %1445 = vst [vmem:[%s2192_s24 + $0x270] sm:$0xff] %v1061_v61  ;;  %v683_v11 = vmul.f32 %v2160_v1, %v298_v58  ;;  %v684_v12 = vmul.f32 %v2160_v1, %v299_v59  ;;  %1446 = vst [vmem:[%s2192_s24 + $0x278] sm:$0xff] %v1062_v3  ;;  %v1065_v16 = vadd.f32 %v2162_v2, %v680_v4  ;;  %v319_v61 = vld [vmem:[%s2153_s13 + $0x350] sm:$0xff]  ;;  %v321_v63 = vld [vmem:[%s2153_s13 + $0x360] sm:$0xff] }
  0x82   : > { %v1066_v17 = vadd.f32 %v2162_v2, %v681_v5  ;;  %v1067_v18 = vadd.f32 %v2162_v2, %v682_v6  ;;  %v685_v19 = vmul.f32 %v2160_v1, %v300_v0  ;;  %1447 = vst [vmem:[%s2192_s24 + $0x280] sm:$0xff] %v1063_v9  ;;  %1448 = vst [vmem:[%s2192_s24 + $0x288] sm:$0xff] %v1064_v10  ;;  %v322_v6 = vld [vmem:[%s2153_s13 + $0x368] sm:$0xff] }
  0x83   : > { %v1068_v22 = vadd.f32 %v2162_v2, %v683_v11  ;;  %v1069_v23 = vadd.f32 %v2162_v2, %v684_v12  ;;  %v686_v24 = vmul.f32 %v2160_v1, %v301_v7  ;;  %v687_v25 = vmul.f32 %v2160_v1, %v302_v8  ;;  %1449 = vst [vmem:[%s2192_s24 + $0x290] sm:$0xff] %v1065_v16  ;;  %v323_v7 = vld [vmem:[%s2153_s13 + $0x370] sm:$0xff]  ;;  %v324_v12 = vld [vmem:[%s2153_s13 + $0x378] sm:$0xff] }
  0x84   : > { %1450 = vst [vmem:[%s2192_s24 + $0x298] sm:$0xff] %v1066_v17  ;;  %1451 = vst [vmem:[%s2192_s24 + $0x2a0] sm:$0xff] %v1067_v18  ;;  %v1070_v27 = vadd.f32 %v2162_v2, %v685_v19  ;;  %v688_v28 = vmul.f32 %v2160_v1, %v303_v13  ;;  %v689_v29 = vmul.f32 %v2160_v1, %v304_v14  ;;  %v325_v17 = vld [vmem:[%s2153_s13 + $0x380] sm:$0xff]  ;;  %v326_v18 = vld [vmem:[%s2153_s13 + $0x388] sm:$0xff] }
  0x85   : > { %v690_v30 = vmul.f32 %v2160_v1, %v305_v15  ;;  %1452 = vst [vmem:[%s2192_s24 + $0x2a8] sm:$0xff] %v1068_v22  ;;  %1453 = vst [vmem:[%s2192_s24 + $0x2b0] sm:$0xff] %v1069_v23  ;;  %v1071_v33 = vadd.f32 %v2162_v2, %v686_v24  ;;  %v1072_v34 = vadd.f32 %v2162_v2, %v687_v25  ;;  %v327_v23 = vld [vmem:[%s2153_s13 + $0x390] sm:$0xff]  ;;  %v328_v24 = vld [vmem:[%s2153_s13 + $0x398] sm:$0xff] }
  0x86   : > { %v691_v35 = vmul.f32 %v2160_v1, %v306_v20  ;;  %v692_v36 = vmul.f32 %v2160_v1, %v307_v21  ;;  %1454 = vst [vmem:[%s2192_s24 + $0x2b8] sm:$0xff] %v1070_v27  ;;  %v1073_v40 = vadd.f32 %v2162_v2, %v688_v28  ;;  %v1074_v41 = vadd.f32 %v2162_v2, %v689_v29  ;;  %v329_v25 = vld [vmem:[%s2153_s13 + $0x3a0] sm:$0xff] }
  0x87   : > { %v1075_v42 = vadd.f32 %v2162_v2, %v690_v30  ;;  %v693_v43 = vmul.f32 %v2160_v1, %v308_v26  ;;  %1455 = vst [vmem:[%s2192_s24 + $0x2c0] sm:$0xff] %v1071_v33  ;;  %1456 = vst [vmem:[%s2192_s24 + $0x2c8] sm:$0xff] %v1072_v34  ;;  %v694_v48 = vmul.f32 %v2160_v1, %v309_v31  ;;  %v330_v30 = vld [vmem:[%s2153_s13 + $0x3a8] sm:$0xff]  ;;  %v331_v31 = vld [vmem:[%s2153_s13 + $0x3b0] sm:$0xff] }
  0x88   : > { %v1076_v46 = vadd.f32 %v2162_v2, %v691_v35  ;;  %v1077_v47 = vadd.f32 %v2162_v2, %v692_v36  ;;  %v695_v49 = vmul.f32 %v2160_v1, %v310_v32  ;;  %1457 = vst [vmem:[%s2192_s24 + $0x2d0] sm:$0xff] %v1073_v40  ;;  %1458 = vst [vmem:[%s2192_s24 + $0x2d8] sm:$0xff] %v1074_v41  ;;  %v332_v36 = vld [vmem:[%s2153_s13 + $0x3b8] sm:$0xff]  ;;  %v333_v41 = vld [vmem:[%s2153_s13 + $0x3c0] sm:$0xff] }
  0x89   : > { %1459 = vst [vmem:[%s2192_s24 + $0x2e0] sm:$0xff] %v1075_v42  ;;  %v1078_v51 = vadd.f32 %v2162_v2, %v693_v43  ;;  %v696_v52 = vmul.f32 %v2160_v1, %v311_v37  ;;  %v697_v53 = vmul.f32 %v2160_v1, %v312_v38  ;;  %v698_v54 = vmul.f32 %v2160_v1, %v313_v39  ;;  %v334_v42 = vld [vmem:[%s2153_s13 + $0x3c8] sm:$0xff] }
  0x8a   : > { %1460 = vst [vmem:[%s2192_s24 + $0x2e8] sm:$0xff] %v1076_v46  ;;  %1461 = vst [vmem:[%s2192_s24 + $0x2f0] sm:$0xff] %v1077_v47  ;;  %v1079_v57 = vadd.f32 %v2162_v2, %v694_v48  ;;  %v1080_v58 = vadd.f32 %v2162_v2, %v695_v49  ;;  %v699_v59 = vmul.f32 %v2160_v1, %v314_v44  ;;  %v335_v47 = vld [vmem:[%s2153_s13 + $0x3d0] sm:$0xff]  ;;  %v336_v48 = vld [vmem:[%s2153_s13 + $0x3d8] sm:$0xff] }
  0x8b   : > { %v700_v60 = vmul.f32 %v2160_v1, %v315_v45  ;;  %1462 = vst [vmem:[%s2192_s24 + $0x2f8] sm:$0xff] %v1078_v51  ;;  %v1081_v0 = vadd.f32 %v2162_v2, %v696_v52  ;;  %v1082_v3 = vadd.f32 %v2162_v2, %v697_v53  ;;  %v1083_v4 = vadd.f32 %v2162_v2, %v698_v54  ;;  %v337_v49 = vld [vmem:[%s2153_s13 + $0x3e0] sm:$0xff]  ;;  %v338_v54 = vld [vmem:[%s2153_s13 + $0x3e8] sm:$0xff] }
  0x8c   : > { %v701_v5 = vmul.f32 %v2160_v1, %v316_v50  ;;  %1463 = vst [vmem:[%s2192_s24 + $0x300] sm:$0xff] %v1079_v57  ;;  %1464 = vst [vmem:[%s2192_s24 + $0x308] sm:$0xff] %v1080_v58  ;;  %v1084_v8 = vadd.f32 %v2162_v2, %v699_v59  ;;  %v702_v10 = vmul.f32 %v2160_v1, %v317_v55  ;;  %v339_v55 = vld [vmem:[%s2153_s13 + $0x3f0] sm:$0xff] }
  0x8d   : > { %v1085_v9 = vadd.f32 %v2162_v2, %v700_v60  ;;  %v703_v11 = vmul.f32 %v2160_v1, %v318_v56  ;;  %1465 = vst [vmem:[%s2192_s24 + $0x310] sm:$0xff] %v1081_v0  ;;  %1466 = vst [vmem:[%s2192_s24 + $0x318] sm:$0xff] %v1082_v3  ;;  %v704_v14 = vmul.f32 %v2160_v1, %v319_v61  ;;  %v340_v60 = vld [vmem:[%s2153_s13 + $0x3f8] sm:$0xff]  ;;  %v341_v3 = vld [vmem:[%s2153_s13 + $0x400] sm:$0xff] }
  0x8e   : > { %1467 = vst [vmem:[%s2192_s24 + $0x320] sm:$0xff] %v1083_v4  ;;  %v1086_v13 = vadd.f32 %v2162_v2, %v701_v5  ;;  %v705_v15 = vmul.f32 %v2160_v1, %v320_v62  ;;  %v706_v16 = vmul.f32 %v2160_v1, %v321_v63  ;;  %1468 = vst [vmem:[%s2192_s24 + $0x328] sm:$0xff] %v1084_v8  ;;  %v342_v4 = vld [vmem:[%s2153_s13 + $0x408] sm:$0xff] }
  0x8f   : > { %1469 = vst [vmem:[%s2192_s24 + $0x330] sm:$0xff] %v1085_v9  ;;  %v1087_v19 = vadd.f32 %v2162_v2, %v702_v10  ;;  %v1088_v20 = vadd.f32 %v2162_v2, %v703_v11  ;;  %v707_v21 = vmul.f32 %v2160_v1, %v322_v6  ;;  %v708_v22 = vmul.f32 %v2160_v1, %v323_v7  ;;  %v343_v9 = vld [vmem:[%s2153_s13 + $0x410] sm:$0xff]  ;;  %v344_v10 = vld [vmem:[%s2153_s13 + $0x418] sm:$0xff]  ;;  %v345_v11 = vld [vmem:[%s2153_s13 + $0x420] sm:$0xff] }
  0x90   : > { %1470 = vst [vmem:[%s2192_s24 + $0x338] sm:$0xff] %v1086_v13  ;;  %v1089_v26 = vadd.f32 %v2162_v2, %v704_v14  ;;  %v1090_v27 = vadd.f32 %v2162_v2, %v705_v15  ;;  %v1091_v28 = vadd.f32 %v2162_v2, %v706_v16  ;;  %v709_v29 = vmul.f32 %v2160_v1, %v324_v12  ;;  %v346_v16 = vld [vmem:[%s2153_s13 + $0x428] sm:$0xff] }
  0x91   : > { %1471 = vst [vmem:[%s2192_s24 + $0x340] sm:$0xff] %v1087_v19  ;;  %1472 = vst [vmem:[%s2192_s24 + $0x348] sm:$0xff] %v1088_v20  ;;  %v1092_v32 = vadd.f32 %v2162_v2, %v707_v21  ;;  %v1093_v33 = vadd.f32 %v2162_v2, %v708_v22  ;;  %v710_v34 = vmul.f32 %v2160_v1, %v325_v17  ;;  %v347_v17 = vld [vmem:[%s2153_s13 + $0x430] sm:$0xff]  ;;  %v348_v22 = vld [vmem:[%s2153_s13 + $0x438] sm:$0xff] }
  0x92   : > { %v711_v35 = vmul.f32 %v2160_v1, %v326_v18  ;;  %1473 = vst [vmem:[%s2192_s24 + $0x350] sm:$0xff] %v1089_v26  ;;  %1474 = vst [vmem:[%s2192_s24 + $0x358] sm:$0xff] %v1090_v27  ;;  %v1094_v37 = vadd.f32 %v2162_v2, %v709_v29  ;;  %v712_v38 = vmul.f32 %v2160_v1, %v327_v23  ;;  %v349_v27 = vld [vmem:[%s2153_s13 + $0x440] sm:$0xff] }
  0x93   : > { %1475 = vst [vmem:[%s2192_s24 + $0x360] sm:$0xff] %v1091_v28  ;;  %v713_v39 = vmul.f32 %v2160_v1, %v328_v24  ;;  %v714_v40 = vmul.f32 %v2160_v1, %v329_v25  ;;  %1476 = vst [vmem:[%s2192_s24 + $0x368] sm:$0xff] %v1092_v32  ;;  %v1095_v43 = vadd.f32 %v2162_v2, %v710_v34  ;;  %v350_v28 = vld [vmem:[%s2153_s13 + $0x448] sm:$0xff]  ;;  %v352_v34 = vld [vmem:[%s2153_s13 + $0x458] sm:$0xff] }
  0x94   : > { %1477 = vst [vmem:[%s2192_s24 + $0x370] sm:$0xff] %v1093_v33  ;;  %v1096_v44 = vadd.f32 %v2162_v2, %v711_v35  ;;  %v715_v45 = vmul.f32 %v2160_v1, %v330_v30  ;;  %v716_v46 = vmul.f32 %v2160_v1, %v331_v31  ;;  %1478 = vst [vmem:[%s2192_s24 + $0x378] sm:$0xff] %v1094_v37  ;;  %v351_v33 = vld [vmem:[%s2153_s13 + $0x450] sm:$0xff]  ;;  %v353_v35 = vld [vmem:[%s2153_s13 + $0x460] sm:$0xff] }
  0x95   : > { %v1097_v50 = vadd.f32 %v2162_v2, %v712_v38  ;;  %v1098_v51 = vadd.f32 %v2162_v2, %v713_v39  ;;  %v1099_v52 = vadd.f32 %v2162_v2, %v714_v40  ;;  %v717_v53 = vmul.f32 %v2160_v1, %v332_v36  ;;  %1479 = vst [vmem:[%s2192_s24 + $0x380] sm:$0xff] %v1095_v43  ;;  %v354_v40 = vld [vmem:[%s2153_s13 + $0x468] sm:$0xff] }
  0x96   : > { %1480 = vst [vmem:[%s2192_s24 + $0x388] sm:$0xff] %v1096_v44  ;;  %v1100_v56 = vadd.f32 %v2162_v2, %v715_v45  ;;  %v1101_v57 = vadd.f32 %v2162_v2, %v716_v46  ;;  %v718_v58 = vmul.f32 %v2160_v1, %v333_v41  ;;  %v719_v59 = vmul.f32 %v2160_v1, %v334_v42  ;;  %v355_v41 = vld [vmem:[%s2153_s13 + $0x470] sm:$0xff]  ;;  %v356_v46 = vld [vmem:[%s2153_s13 + $0x478] sm:$0xff] }
  0x97   : > { %1481 = vst [vmem:[%s2192_s24 + $0x390] sm:$0xff] %v1097_v50  ;;  %1482 = vst [vmem:[%s2192_s24 + $0x398] sm:$0xff] %v1098_v51  ;;  %v1102_v61 = vadd.f32 %v2162_v2, %v717_v53  ;;  %v720_v62 = vmul.f32 %v2160_v1, %v335_v47  ;;  %v721_v63 = vmul.f32 %v2160_v1, %v336_v48  ;;  %v357_v51 = vld [vmem:[%s2153_s13 + $0x480] sm:$0xff] }
  0x98   : > { %1483 = vst [vmem:[%s2192_s24 + $0x3a0] sm:$0xff] %v1099_v52  ;;  %v722_v0 = vmul.f32 %v2160_v1, %v337_v49  ;;  %1484 = vst [vmem:[%s2192_s24 + $0x3a8] sm:$0xff] %v1100_v56  ;;  %v1103_v5 = vadd.f32 %v2162_v2, %v718_v58  ;;  %v1104_v6 = vadd.f32 %v2162_v2, %v719_v59  ;;  %v358_v52 = vld [vmem:[%s2153_s13 + $0x488] sm:$0xff]  ;;  %v360_v58 = vld [vmem:[%s2153_s13 + $0x498] sm:$0xff] }
  0x99   : > { %1485 = vst [vmem:[%s2192_s24 + $0x3b0] sm:$0xff] %v1101_v57  ;;  %v723_v7 = vmul.f32 %v2160_v1, %v338_v54  ;;  %v724_v8 = vmul.f32 %v2160_v1, %v339_v55  ;;  %1486 = vst [vmem:[%s2192_s24 + $0x3b8] sm:$0xff] %v1102_v61  ;;  %v1105_v12 = vadd.f32 %v2162_v2, %v720_v62  ;;  %v359_v57 = vld [vmem:[%s2153_s13 + $0x490] sm:$0xff]  ;;  %v361_v59 = vld [vmem:[%s2153_s13 + $0x4a0] sm:$0xff] }
  0x9a   : > { %v1106_v13 = vadd.f32 %v2162_v2, %v721_v63  ;;  %v1107_v14 = vadd.f32 %v2162_v2, %v722_v0  ;;  %v725_v15 = vmul.f32 %v2160_v1, %v340_v60  ;;  %1487 = vst [vmem:[%s2192_s24 + $0x3c0] sm:$0xff] %v1103_v5  ;;  %1488 = vst [vmem:[%s2192_s24 + $0x3c8] sm:$0xff] %v1104_v6  ;;  %v362_v0 = vld [vmem:[%s2153_s13 + $0x4a8] sm:$0xff] }
  0x9b   : > { %v1108_v18 = vadd.f32 %v2162_v2, %v723_v7  ;;  %v1109_v19 = vadd.f32 %v2162_v2, %v724_v8  ;;  %v726_v20 = vmul.f32 %v2160_v1, %v341_v3  ;;  %v727_v21 = vmul.f32 %v2160_v1, %v342_v4  ;;  %1489 = vst [vmem:[%s2192_s24 + $0x3d0] sm:$0xff] %v1105_v12  ;;  %v363_v3 = vld [vmem:[%s2153_s13 + $0x4b0] sm:$0xff]  ;;  %v364_v8 = vld [vmem:[%s2153_s13 + $0x4b8] sm:$0xff] }
  0x9c   : > { %1490 = vst [vmem:[%s2192_s24 + $0x3d8] sm:$0xff] %v1106_v13  ;;  %1491 = vst [vmem:[%s2192_s24 + $0x3e0] sm:$0xff] %v1107_v14  ;;  %v1110_v23 = vadd.f32 %v2162_v2, %v725_v15  ;;  %v728_v24 = vmul.f32 %v2160_v1, %v343_v9  ;;  %v729_v25 = vmul.f32 %v2160_v1, %v344_v10  ;;  %v365_v13 = vld [vmem:[%s2153_s13 + $0x4c0] sm:$0xff]  ;;  %v366_v14 = vld [vmem:[%s2153_s13 + $0x4c8] sm:$0xff] }
  0x9d   : > { %v730_v26 = vmul.f32 %v2160_v1, %v345_v11  ;;  %1492 = vst [vmem:[%s2192_s24 + $0x3e8] sm:$0xff] %v1108_v18  ;;  %1493 = vst [vmem:[%s2192_s24 + $0x3f0] sm:$0xff] %v1109_v19  ;;  %v1111_v29 = vadd.f32 %v2162_v2, %v726_v20  ;;  %v1112_v30 = vadd.f32 %v2162_v2, %v727_v21  ;;  %v367_v19 = vld [vmem:[%s2153_s13 + $0x4d0] sm:$0xff]  ;;  %v368_v20 = vld [vmem:[%s2153_s13 + $0x4d8] sm:$0xff] }
  0x9e   : > { %v731_v31 = vmul.f32 %v2160_v1, %v346_v16  ;;  %v732_v32 = vmul.f32 %v2160_v1, %v347_v17  ;;  %1494 = vst [vmem:[%s2192_s24 + $0x3f8] sm:$0xff] %v1110_v23  ;;  %v1113_v36 = vadd.f32 %v2162_v2, %v728_v24  ;;  %v1114_v37 = vadd.f32 %v2162_v2, %v729_v25  ;;  %v369_v21 = vld [vmem:[%s2153_s13 + $0x4e0] sm:$0xff] }
  0x9f   : > { %v1115_v38 = vadd.f32 %v2162_v2, %v730_v26  ;;  %v733_v39 = vmul.f32 %v2160_v1, %v348_v22  ;;  %1495 = vst [vmem:[%s2192_s24 + $0x400] sm:$0xff] %v1111_v29  ;;  %1496 = vst [vmem:[%s2192_s24 + $0x408] sm:$0xff] %v1112_v30  ;;  %v734_v44 = vmul.f32 %v2160_v1, %v349_v27  ;;  %v370_v26 = vld [vmem:[%s2153_s13 + $0x4e8] sm:$0xff]  ;;  %v371_v27 = vld [vmem:[%s2153_s13 + $0x4f0] sm:$0xff] }
  0xa0   : > { %v1116_v42 = vadd.f32 %v2162_v2, %v731_v31  ;;  %v1117_v43 = vadd.f32 %v2162_v2, %v732_v32  ;;  %v735_v45 = vmul.f32 %v2160_v1, %v350_v28  ;;  %1497 = vst [vmem:[%s2192_s24 + $0x410] sm:$0xff] %v1113_v36  ;;  %1498 = vst [vmem:[%s2192_s24 + $0x418] sm:$0xff] %v1114_v37  ;;  %v372_v32 = vld [vmem:[%s2153_s13 + $0x4f8] sm:$0xff]  ;;  %v373_v37 = vld [vmem:[%s2153_s13 + $0x500] sm:$0xff] }
  0xa1   : > { %1499 = vst [vmem:[%s2192_s24 + $0x420] sm:$0xff] %v1115_v38  ;;  %v1118_v47 = vadd.f32 %v2162_v2, %v733_v39  ;;  %v736_v48 = vmul.f32 %v2160_v1, %v351_v33  ;;  %v737_v49 = vmul.f32 %v2160_v1, %v352_v34  ;;  %v738_v50 = vmul.f32 %v2160_v1, %v353_v35  ;;  %v374_v38 = vld [vmem:[%s2153_s13 + $0x508] sm:$0xff] }
  0xa2   : > { %1500 = vst [vmem:[%s2192_s24 + $0x428] sm:$0xff] %v1116_v42  ;;  %1501 = vst [vmem:[%s2192_s24 + $0x430] sm:$0xff] %v1117_v43  ;;  %v1119_v53 = vadd.f32 %v2162_v2, %v734_v44  ;;  %v1120_v54 = vadd.f32 %v2162_v2, %v735_v45  ;;  %v739_v55 = vmul.f32 %v2160_v1, %v354_v40  ;;  %v375_v43 = vld [vmem:[%s2153_s13 + $0x510] sm:$0xff]  ;;  %v376_v44 = vld [vmem:[%s2153_s13 + $0x518] sm:$0xff] }
  0xa3   : > { %v740_v56 = vmul.f32 %v2160_v1, %v355_v41  ;;  %1502 = vst [vmem:[%s2192_s24 + $0x438] sm:$0xff] %v1118_v47  ;;  %v1121_v60 = vadd.f32 %v2162_v2, %v736_v48  ;;  %v1122_v61 = vadd.f32 %v2162_v2, %v737_v49  ;;  %v1123_v62 = vadd.f32 %v2162_v2, %v738_v50  ;;  %v377_v45 = vld [vmem:[%s2153_s13 + $0x520] sm:$0xff]  ;;  %v378_v50 = vld [vmem:[%s2153_s13 + $0x528] sm:$0xff] }
  0xa4   : > { %v741_v63 = vmul.f32 %v2160_v1, %v356_v46  ;;  %1503 = vst [vmem:[%s2192_s24 + $0x440] sm:$0xff] %v1119_v53  ;;  %1504 = vst [vmem:[%s2192_s24 + $0x448] sm:$0xff] %v1120_v54  ;;  %v1124_v4 = vadd.f32 %v2162_v2, %v739_v55  ;;  %v742_v6 = vmul.f32 %v2160_v1, %v357_v51  ;;  %v379_v51 = vld [vmem:[%s2153_s13 + $0x530] sm:$0xff] }
  0xa5   : > { %v1125_v5 = vadd.f32 %v2162_v2, %v740_v56  ;;  %v743_v7 = vmul.f32 %v2160_v1, %v358_v52  ;;  %1505 = vst [vmem:[%s2192_s24 + $0x450] sm:$0xff] %v1121_v60  ;;  %1506 = vst [vmem:[%s2192_s24 + $0x458] sm:$0xff] %v1122_v61  ;;  %v744_v10 = vmul.f32 %v2160_v1, %v359_v57  ;;  %v380_v56 = vld [vmem:[%s2153_s13 + $0x538] sm:$0xff]  ;;  %v381_v61 = vld [vmem:[%s2153_s13 + $0x540] sm:$0xff] }
  0xa6   : > { %1507 = vst [vmem:[%s2192_s24 + $0x460] sm:$0xff] %v1123_v62  ;;  %v1126_v9 = vadd.f32 %v2162_v2, %v741_v63  ;;  %v745_v11 = vmul.f32 %v2160_v1, %v360_v58  ;;  %v746_v12 = vmul.f32 %v2160_v1, %v361_v59  ;;  %1508 = vst [vmem:[%s2192_s24 + $0x468] sm:$0xff] %v1124_v4  ;;  %v382_v62 = vld [vmem:[%s2153_s13 + $0x548] sm:$0xff] }
  0xa7   : > { %1509 = vst [vmem:[%s2192_s24 + $0x470] sm:$0xff] %v1125_v5  ;;  %v1127_v15 = vadd.f32 %v2162_v2, %v742_v6  ;;  %v1128_v16 = vadd.f32 %v2162_v2, %v743_v7  ;;  %v747_v17 = vmul.f32 %v2160_v1, %v362_v0  ;;  %v748_v18 = vmul.f32 %v2160_v1, %v363_v3  ;;  %v383_v5 = vld [vmem:[%s2153_s13 + $0x550] sm:$0xff]  ;;  %v384_v6 = vld [vmem:[%s2153_s13 + $0x558] sm:$0xff]  ;;  %v385_v7 = vld [vmem:[%s2153_s13 + $0x560] sm:$0xff] }
  0xa8   : > { %1510 = vst [vmem:[%s2192_s24 + $0x478] sm:$0xff] %v1126_v9  ;;  %v1129_v22 = vadd.f32 %v2162_v2, %v744_v10  ;;  %v1130_v23 = vadd.f32 %v2162_v2, %v745_v11  ;;  %v1131_v24 = vadd.f32 %v2162_v2, %v746_v12  ;;  %v749_v25 = vmul.f32 %v2160_v1, %v364_v8  ;;  %v386_v12 = vld [vmem:[%s2153_s13 + $0x568] sm:$0xff] }
  0xa9   : > { %1511 = vst [vmem:[%s2192_s24 + $0x480] sm:$0xff] %v1127_v15  ;;  %1512 = vst [vmem:[%s2192_s24 + $0x488] sm:$0xff] %v1128_v16  ;;  %v1132_v28 = vadd.f32 %v2162_v2, %v747_v17  ;;  %v1133_v29 = vadd.f32 %v2162_v2, %v748_v18  ;;  %v750_v30 = vmul.f32 %v2160_v1, %v365_v13  ;;  %v387_v13 = vld [vmem:[%s2153_s13 + $0x570] sm:$0xff]  ;;  %v388_v18 = vld [vmem:[%s2153_s13 + $0x578] sm:$0xff] }
  0xaa   : > { %v751_v31 = vmul.f32 %v2160_v1, %v366_v14  ;;  %1513 = vst [vmem:[%s2192_s24 + $0x490] sm:$0xff] %v1129_v22  ;;  %1514 = vst [vmem:[%s2192_s24 + $0x498] sm:$0xff] %v1130_v23  ;;  %v1134_v33 = vadd.f32 %v2162_v2, %v749_v25  ;;  %v752_v34 = vmul.f32 %v2160_v1, %v367_v19  ;;  %v389_v23 = vld [vmem:[%s2153_s13 + $0x580] sm:$0xff] }
  0xab   : > { %1515 = vst [vmem:[%s2192_s24 + $0x4a0] sm:$0xff] %v1131_v24  ;;  %v753_v35 = vmul.f32 %v2160_v1, %v368_v20  ;;  %v754_v36 = vmul.f32 %v2160_v1, %v369_v21  ;;  %1516 = vst [vmem:[%s2192_s24 + $0x4a8] sm:$0xff] %v1132_v28  ;;  %v1135_v39 = vadd.f32 %v2162_v2, %v750_v30  ;;  %v390_v24 = vld [vmem:[%s2153_s13 + $0x588] sm:$0xff]  ;;  %v392_v30 = vld [vmem:[%s2153_s13 + $0x598] sm:$0xff] }
  0xac   : > { %1517 = vst [vmem:[%s2192_s24 + $0x4b0] sm:$0xff] %v1133_v29  ;;  %v1136_v40 = vadd.f32 %v2162_v2, %v751_v31  ;;  %v755_v41 = vmul.f32 %v2160_v1, %v370_v26  ;;  %v756_v42 = vmul.f32 %v2160_v1, %v371_v27  ;;  %1518 = vst [vmem:[%s2192_s24 + $0x4b8] sm:$0xff] %v1134_v33  ;;  %v391_v29 = vld [vmem:[%s2153_s13 + $0x590] sm:$0xff]  ;;  %v393_v31 = vld [vmem:[%s2153_s13 + $0x5a0] sm:$0xff] }
  0xad   : > { %v1137_v46 = vadd.f32 %v2162_v2, %v752_v34  ;;  %v1138_v47 = vadd.f32 %v2162_v2, %v753_v35  ;;  %v1139_v48 = vadd.f32 %v2162_v2, %v754_v36  ;;  %v757_v49 = vmul.f32 %v2160_v1, %v372_v32  ;;  %1519 = vst [vmem:[%s2192_s24 + $0x4c0] sm:$0xff] %v1135_v39  ;;  %v394_v36 = vld [vmem:[%s2153_s13 + $0x5a8] sm:$0xff] }
  0xae   : > { %1520 = vst [vmem:[%s2192_s24 + $0x4c8] sm:$0xff] %v1136_v40  ;;  %v1140_v52 = vadd.f32 %v2162_v2, %v755_v41  ;;  %v1141_v53 = vadd.f32 %v2162_v2, %v756_v42  ;;  %v758_v54 = vmul.f32 %v2160_v1, %v373_v37  ;;  %v759_v55 = vmul.f32 %v2160_v1, %v374_v38  ;;  %v395_v37 = vld [vmem:[%s2153_s13 + $0x5b0] sm:$0xff]  ;;  %v396_v42 = vld [vmem:[%s2153_s13 + $0x5b8] sm:$0xff] }
  0xaf   : > { %1521 = vst [vmem:[%s2192_s24 + $0x4d0] sm:$0xff] %v1137_v46  ;;  %1522 = vst [vmem:[%s2192_s24 + $0x4d8] sm:$0xff] %v1138_v47  ;;  %v1142_v57 = vadd.f32 %v2162_v2, %v757_v49  ;;  %v760_v58 = vmul.f32 %v2160_v1, %v375_v43  ;;  %v761_v59 = vmul.f32 %v2160_v1, %v376_v44  ;;  %v397_v47 = vld [vmem:[%s2153_s13 + $0x5c0] sm:$0xff] }
  0xb0   : > { %1523 = vst [vmem:[%s2192_s24 + $0x4e0] sm:$0xff] %v1139_v48  ;;  %v762_v60 = vmul.f32 %v2160_v1, %v377_v45  ;;  %1524 = vst [vmem:[%s2192_s24 + $0x4e8] sm:$0xff] %v1140_v52  ;;  %v1143_v63 = vadd.f32 %v2162_v2, %v758_v54  ;;  %v1144_v0 = vadd.f32 %v2162_v2, %v759_v55  ;;  %v398_v48 = vld [vmem:[%s2153_s13 + $0x5c8] sm:$0xff]  ;;  %v400_v54 = vld [vmem:[%s2153_s13 + $0x5d8] sm:$0xff] }
  0xb1   : > { %1525 = vst [vmem:[%s2192_s24 + $0x4f0] sm:$0xff] %v1141_v53  ;;  %v763_v3 = vmul.f32 %v2160_v1, %v378_v50  ;;  %v764_v4 = vmul.f32 %v2160_v1, %v379_v51  ;;  %1526 = vst [vmem:[%s2192_s24 + $0x4f8] sm:$0xff] %v1142_v57  ;;  %v1145_v8 = vadd.f32 %v2162_v2, %v760_v58  ;;  %v399_v53 = vld [vmem:[%s2153_s13 + $0x5d0] sm:$0xff]  ;;  %v401_v55 = vld [vmem:[%s2153_s13 + $0x5e0] sm:$0xff] }
  0xb2   : > { %v1146_v9 = vadd.f32 %v2162_v2, %v761_v59  ;;  %v1147_v10 = vadd.f32 %v2162_v2, %v762_v60  ;;  %v765_v11 = vmul.f32 %v2160_v1, %v380_v56  ;;  %1527 = vst [vmem:[%s2192_s24 + $0x500] sm:$0xff] %v1143_v63  ;;  %1528 = vst [vmem:[%s2192_s24 + $0x508] sm:$0xff] %v1144_v0  ;;  %v402_v60 = vld [vmem:[%s2153_s13 + $0x5e8] sm:$0xff] }
  0xb3   : > { %v1148_v14 = vadd.f32 %v2162_v2, %v763_v3  ;;  %v1149_v15 = vadd.f32 %v2162_v2, %v764_v4  ;;  %v766_v16 = vmul.f32 %v2160_v1, %v381_v61  ;;  %v767_v17 = vmul.f32 %v2160_v1, %v382_v62  ;;  %1529 = vst [vmem:[%s2192_s24 + $0x510] sm:$0xff] %v1145_v8  ;;  %v403_v61 = vld [vmem:[%s2153_s13 + $0x5f0] sm:$0xff]  ;;  %v404_v4 = vld [vmem:[%s2153_s13 + $0x5f8] sm:$0xff] }
  0xb4   : > { %1530 = vst [vmem:[%s2192_s24 + $0x518] sm:$0xff] %v1146_v9  ;;  %1531 = vst [vmem:[%s2192_s24 + $0x520] sm:$0xff] %v1147_v10  ;;  %v1150_v19 = vadd.f32 %v2162_v2, %v765_v11  ;;  %v768_v20 = vmul.f32 %v2160_v1, %v383_v5  ;;  %v769_v21 = vmul.f32 %v2160_v1, %v384_v6  ;;  %v405_v9 = vld [vmem:[%s2153_s13 + $0x600] sm:$0xff]  ;;  %v406_v10 = vld [vmem:[%s2153_s13 + $0x608] sm:$0xff] }
  0xb5   : > { %v770_v22 = vmul.f32 %v2160_v1, %v385_v7  ;;  %1532 = vst [vmem:[%s2192_s24 + $0x528] sm:$0xff] %v1148_v14  ;;  %1533 = vst [vmem:[%s2192_s24 + $0x530] sm:$0xff] %v1149_v15  ;;  %v1151_v25 = vadd.f32 %v2162_v2, %v766_v16  ;;  %v1152_v26 = vadd.f32 %v2162_v2, %v767_v17  ;;  %v407_v15 = vld [vmem:[%s2153_s13 + $0x610] sm:$0xff]  ;;  %v408_v16 = vld [vmem:[%s2153_s13 + $0x618] sm:$0xff] }
  0xb6   : > { %v771_v27 = vmul.f32 %v2160_v1, %v386_v12  ;;  %v772_v28 = vmul.f32 %v2160_v1, %v387_v13  ;;  %1534 = vst [vmem:[%s2192_s24 + $0x538] sm:$0xff] %v1150_v19  ;;  %v1153_v32 = vadd.f32 %v2162_v2, %v768_v20  ;;  %v1154_v33 = vadd.f32 %v2162_v2, %v769_v21  ;;  %v409_v17 = vld [vmem:[%s2153_s13 + $0x620] sm:$0xff] }
  0xb7   : > { %v1155_v34 = vadd.f32 %v2162_v2, %v770_v22  ;;  %v773_v35 = vmul.f32 %v2160_v1, %v388_v18  ;;  %1535 = vst [vmem:[%s2192_s24 + $0x540] sm:$0xff] %v1151_v25  ;;  %1536 = vst [vmem:[%s2192_s24 + $0x548] sm:$0xff] %v1152_v26  ;;  %v774_v40 = vmul.f32 %v2160_v1, %v389_v23  ;;  %v410_v22 = vld [vmem:[%s2153_s13 + $0x628] sm:$0xff]  ;;  %v411_v23 = vld [vmem:[%s2153_s13 + $0x630] sm:$0xff] }
  0xb8   : > { %v1156_v38 = vadd.f32 %v2162_v2, %v771_v27  ;;  %v1157_v39 = vadd.f32 %v2162_v2, %v772_v28  ;;  %v775_v41 = vmul.f32 %v2160_v1, %v390_v24  ;;  %1537 = vst [vmem:[%s2192_s24 + $0x550] sm:$0xff] %v1153_v32  ;;  %1538 = vst [vmem:[%s2192_s24 + $0x558] sm:$0xff] %v1154_v33  ;;  %v412_v28 = vld [vmem:[%s2153_s13 + $0x638] sm:$0xff]  ;;  %v413_v33 = vld [vmem:[%s2153_s13 + $0x640] sm:$0xff] }
  0xb9   : > { %1539 = vst [vmem:[%s2192_s24 + $0x560] sm:$0xff] %v1155_v34  ;;  %v1158_v43 = vadd.f32 %v2162_v2, %v773_v35  ;;  %v776_v44 = vmul.f32 %v2160_v1, %v391_v29  ;;  %v777_v45 = vmul.f32 %v2160_v1, %v392_v30  ;;  %v778_v46 = vmul.f32 %v2160_v1, %v393_v31  ;;  %v414_v34 = vld [vmem:[%s2153_s13 + $0x648] sm:$0xff] }
  0xba   : > { %1540 = vst [vmem:[%s2192_s24 + $0x568] sm:$0xff] %v1156_v38  ;;  %1541 = vst [vmem:[%s2192_s24 + $0x570] sm:$0xff] %v1157_v39  ;;  %v1159_v49 = vadd.f32 %v2162_v2, %v774_v40  ;;  %v1160_v50 = vadd.f32 %v2162_v2, %v775_v41  ;;  %v779_v51 = vmul.f32 %v2160_v1, %v394_v36  ;;  %v415_v39 = vld [vmem:[%s2153_s13 + $0x650] sm:$0xff]  ;;  %v416_v40 = vld [vmem:[%s2153_s13 + $0x658] sm:$0xff] }
  0xbb   : > { %v780_v52 = vmul.f32 %v2160_v1, %v395_v37  ;;  %1542 = vst [vmem:[%s2192_s24 + $0x578] sm:$0xff] %v1158_v43  ;;  %v1161_v56 = vadd.f32 %v2162_v2, %v776_v44  ;;  %v1162_v57 = vadd.f32 %v2162_v2, %v777_v45  ;;  %v1163_v58 = vadd.f32 %v2162_v2, %v778_v46  ;;  %v417_v41 = vld [vmem:[%s2153_s13 + $0x660] sm:$0xff]  ;;  %v418_v46 = vld [vmem:[%s2153_s13 + $0x668] sm:$0xff] }
  0xbc   : > { %v781_v59 = vmul.f32 %v2160_v1, %v396_v42  ;;  %1543 = vst [vmem:[%s2192_s24 + $0x580] sm:$0xff] %v1159_v49  ;;  %1544 = vst [vmem:[%s2192_s24 + $0x588] sm:$0xff] %v1160_v50  ;;  %v1164_v62 = vadd.f32 %v2162_v2, %v779_v51  ;;  %v782_v0 = vmul.f32 %v2160_v1, %v397_v47  ;;  %v419_v47 = vld [vmem:[%s2153_s13 + $0x670] sm:$0xff] }
  0xbd   : > { %v1165_v63 = vadd.f32 %v2162_v2, %v780_v52  ;;  %v783_v3 = vmul.f32 %v2160_v1, %v398_v48  ;;  %1545 = vst [vmem:[%s2192_s24 + $0x590] sm:$0xff] %v1161_v56  ;;  %1546 = vst [vmem:[%s2192_s24 + $0x598] sm:$0xff] %v1162_v57  ;;  %v784_v6 = vmul.f32 %v2160_v1, %v399_v53  ;;  %v420_v52 = vld [vmem:[%s2153_s13 + $0x678] sm:$0xff]  ;;  %v421_v57 = vld [vmem:[%s2153_s13 + $0x680] sm:$0xff] }
  0xbe   : > { %1547 = vst [vmem:[%s2192_s24 + $0x5a0] sm:$0xff] %v1163_v58  ;;  %v1166_v5 = vadd.f32 %v2162_v2, %v781_v59  ;;  %v785_v7 = vmul.f32 %v2160_v1, %v400_v54  ;;  %v786_v8 = vmul.f32 %v2160_v1, %v401_v55  ;;  %1548 = vst [vmem:[%s2192_s24 + $0x5a8] sm:$0xff] %v1164_v62  ;;  %v422_v58 = vld [vmem:[%s2153_s13 + $0x688] sm:$0xff] }
  0xbf   : > { %1549 = vst [vmem:[%s2192_s24 + $0x5b0] sm:$0xff] %v1165_v63  ;;  %v1167_v11 = vadd.f32 %v2162_v2, %v782_v0  ;;  %v1168_v12 = vadd.f32 %v2162_v2, %v783_v3  ;;  %v787_v13 = vmul.f32 %v2160_v1, %v402_v60  ;;  %v788_v14 = vmul.f32 %v2160_v1, %v403_v61  ;;  %v423_v63 = vld [vmem:[%s2153_s13 + $0x690] sm:$0xff]  ;;  %v424_v0 = vld [vmem:[%s2153_s13 + $0x698] sm:$0xff]  ;;  %v425_v3 = vld [vmem:[%s2153_s13 + $0x6a0] sm:$0xff] }
  0xc0   : > { %1550 = vst [vmem:[%s2192_s24 + $0x5b8] sm:$0xff] %v1166_v5  ;;  %v1169_v18 = vadd.f32 %v2162_v2, %v784_v6  ;;  %v1170_v19 = vadd.f32 %v2162_v2, %v785_v7  ;;  %v1171_v20 = vadd.f32 %v2162_v2, %v786_v8  ;;  %v789_v21 = vmul.f32 %v2160_v1, %v404_v4  ;;  %v426_v8 = vld [vmem:[%s2153_s13 + $0x6a8] sm:$0xff] }
  0xc1   : > { %1551 = vst [vmem:[%s2192_s24 + $0x5c0] sm:$0xff] %v1167_v11  ;;  %1552 = vst [vmem:[%s2192_s24 + $0x5c8] sm:$0xff] %v1168_v12  ;;  %v1172_v24 = vadd.f32 %v2162_v2, %v787_v13  ;;  %v1173_v25 = vadd.f32 %v2162_v2, %v788_v14  ;;  %v790_v26 = vmul.f32 %v2160_v1, %v405_v9  ;;  %v427_v9 = vld [vmem:[%s2153_s13 + $0x6b0] sm:$0xff]  ;;  %v428_v14 = vld [vmem:[%s2153_s13 + $0x6b8] sm:$0xff] }
  0xc2   : > { %v791_v27 = vmul.f32 %v2160_v1, %v406_v10  ;;  %1553 = vst [vmem:[%s2192_s24 + $0x5d0] sm:$0xff] %v1169_v18  ;;  %1554 = vst [vmem:[%s2192_s24 + $0x5d8] sm:$0xff] %v1170_v19  ;;  %v1174_v29 = vadd.f32 %v2162_v2, %v789_v21  ;;  %v792_v30 = vmul.f32 %v2160_v1, %v407_v15  ;;  %v429_v19 = vld [vmem:[%s2153_s13 + $0x6c0] sm:$0xff] }
  0xc3   : > { %1555 = vst [vmem:[%s2192_s24 + $0x5e0] sm:$0xff] %v1171_v20  ;;  %v793_v31 = vmul.f32 %v2160_v1, %v408_v16  ;;  %v794_v32 = vmul.f32 %v2160_v1, %v409_v17  ;;  %1556 = vst [vmem:[%s2192_s24 + $0x5e8] sm:$0xff] %v1172_v24  ;;  %v1175_v35 = vadd.f32 %v2162_v2, %v790_v26  ;;  %v430_v20 = vld [vmem:[%s2153_s13 + $0x6c8] sm:$0xff]  ;;  %v432_v26 = vld [vmem:[%s2153_s13 + $0x6d8] sm:$0xff] }
  0xc4   : > { %1557 = vst [vmem:[%s2192_s24 + $0x5f0] sm:$0xff] %v1173_v25  ;;  %v1176_v36 = vadd.f32 %v2162_v2, %v791_v27  ;;  %v795_v37 = vmul.f32 %v2160_v1, %v410_v22  ;;  %v796_v38 = vmul.f32 %v2160_v1, %v411_v23  ;;  %1558 = vst [vmem:[%s2192_s24 + $0x5f8] sm:$0xff] %v1174_v29  ;;  %v431_v25 = vld [vmem:[%s2153_s13 + $0x6d0] sm:$0xff]  ;;  %v433_v27 = vld [vmem:[%s2153_s13 + $0x6e0] sm:$0xff] }
  0xc5   : > { %v1177_v42 = vadd.f32 %v2162_v2, %v792_v30  ;;  %v1178_v43 = vadd.f32 %v2162_v2, %v793_v31  ;;  %v1179_v44 = vadd.f32 %v2162_v2, %v794_v32  ;;  %v797_v45 = vmul.f32 %v2160_v1, %v412_v28  ;;  %1559 = vst [vmem:[%s2192_s24 + $0x600] sm:$0xff] %v1175_v35  ;;  %v434_v32 = vld [vmem:[%s2153_s13 + $0x6e8] sm:$0xff] }
  0xc6   : > { %1560 = vst [vmem:[%s2192_s24 + $0x608] sm:$0xff] %v1176_v36  ;;  %v1180_v48 = vadd.f32 %v2162_v2, %v795_v37  ;;  %v1181_v49 = vadd.f32 %v2162_v2, %v796_v38  ;;  %v798_v50 = vmul.f32 %v2160_v1, %v413_v33  ;;  %v799_v51 = vmul.f32 %v2160_v1, %v414_v34  ;;  %v435_v33 = vld [vmem:[%s2153_s13 + $0x6f0] sm:$0xff]  ;;  %v436_v38 = vld [vmem:[%s2153_s13 + $0x6f8] sm:$0xff] }
  0xc7   : > { %1561 = vst [vmem:[%s2192_s24 + $0x610] sm:$0xff] %v1177_v42  ;;  %1562 = vst [vmem:[%s2192_s24 + $0x618] sm:$0xff] %v1178_v43  ;;  %v1182_v53 = vadd.f32 %v2162_v2, %v797_v45  ;;  %v800_v54 = vmul.f32 %v2160_v1, %v415_v39  ;;  %v801_v55 = vmul.f32 %v2160_v1, %v416_v40  ;;  %v437_v43 = vld [vmem:[%s2153_s13 + $0x700] sm:$0xff] }
  0xc8   : > { %1563 = vst [vmem:[%s2192_s24 + $0x620] sm:$0xff] %v1179_v44  ;;  %v802_v56 = vmul.f32 %v2160_v1, %v417_v41  ;;  %1564 = vst [vmem:[%s2192_s24 + $0x628] sm:$0xff] %v1180_v48  ;;  %v1183_v59 = vadd.f32 %v2162_v2, %v798_v50  ;;  %v1184_v60 = vadd.f32 %v2162_v2, %v799_v51  ;;  %v438_v44 = vld [vmem:[%s2153_s13 + $0x708] sm:$0xff]  ;;  %v440_v50 = vld [vmem:[%s2153_s13 + $0x718] sm:$0xff] }
  0xc9   : > { %1565 = vst [vmem:[%s2192_s24 + $0x630] sm:$0xff] %v1181_v49  ;;  %v803_v61 = vmul.f32 %v2160_v1, %v418_v46  ;;  %v804_v62 = vmul.f32 %v2160_v1, %v419_v47  ;;  %1566 = vst [vmem:[%s2192_s24 + $0x638] sm:$0xff] %v1182_v53  ;;  %v1185_v4 = vadd.f32 %v2162_v2, %v800_v54  ;;  %v439_v49 = vld [vmem:[%s2153_s13 + $0x710] sm:$0xff]  ;;  %v441_v51 = vld [vmem:[%s2153_s13 + $0x720] sm:$0xff] }
  0xca   : > { %v1186_v5 = vadd.f32 %v2162_v2, %v801_v55  ;;  %v1187_v6 = vadd.f32 %v2162_v2, %v802_v56  ;;  %v805_v7 = vmul.f32 %v2160_v1, %v420_v52  ;;  %1567 = vst [vmem:[%s2192_s24 + $0x640] sm:$0xff] %v1183_v59  ;;  %1568 = vst [vmem:[%s2192_s24 + $0x648] sm:$0xff] %v1184_v60  ;;  %v442_v56 = vld [vmem:[%s2153_s13 + $0x728] sm:$0xff] }
  0xcb   : > { %v1188_v10 = vadd.f32 %v2162_v2, %v803_v61  ;;  %v1189_v11 = vadd.f32 %v2162_v2, %v804_v62  ;;  %v806_v12 = vmul.f32 %v2160_v1, %v421_v57  ;;  %v807_v13 = vmul.f32 %v2160_v1, %v422_v58  ;;  %1569 = vst [vmem:[%s2192_s24 + $0x650] sm:$0xff] %v1185_v4  ;;  %v443_v57 = vld [vmem:[%s2153_s13 + $0x730] sm:$0xff]  ;;  %v444_v62 = vld [vmem:[%s2153_s13 + $0x738] sm:$0xff] }
  0xcc   : > { %1570 = vst [vmem:[%s2192_s24 + $0x658] sm:$0xff] %v1186_v5  ;;  %1571 = vst [vmem:[%s2192_s24 + $0x660] sm:$0xff] %v1187_v6  ;;  %v1190_v15 = vadd.f32 %v2162_v2, %v805_v7  ;;  %v808_v16 = vmul.f32 %v2160_v1, %v423_v63  ;;  %v809_v17 = vmul.f32 %v2160_v1, %v424_v0  ;;  %v445_v5 = vld [vmem:[%s2153_s13 + $0x740] sm:$0xff]  ;;  %v446_v6 = vld [vmem:[%s2153_s13 + $0x748] sm:$0xff] }
  0xcd   : > { %v810_v18 = vmul.f32 %v2160_v1, %v425_v3  ;;  %1572 = vst [vmem:[%s2192_s24 + $0x668] sm:$0xff] %v1188_v10  ;;  %1573 = vst [vmem:[%s2192_s24 + $0x670] sm:$0xff] %v1189_v11  ;;  %v1191_v21 = vadd.f32 %v2162_v2, %v806_v12  ;;  %v1192_v22 = vadd.f32 %v2162_v2, %v807_v13  ;;  %v447_v11 = vld [vmem:[%s2153_s13 + $0x750] sm:$0xff]  ;;  %v448_v12 = vld [vmem:[%s2153_s13 + $0x758] sm:$0xff] }
  0xce   : > { %v811_v23 = vmul.f32 %v2160_v1, %v426_v8  ;;  %v812_v24 = vmul.f32 %v2160_v1, %v427_v9  ;;  %1574 = vst [vmem:[%s2192_s24 + $0x678] sm:$0xff] %v1190_v15  ;;  %v1193_v28 = vadd.f32 %v2162_v2, %v808_v16  ;;  %v1194_v29 = vadd.f32 %v2162_v2, %v809_v17  ;;  %v449_v13 = vld [vmem:[%s2153_s13 + $0x760] sm:$0xff] }
  0xcf   : > { %v1195_v30 = vadd.f32 %v2162_v2, %v810_v18  ;;  %v813_v31 = vmul.f32 %v2160_v1, %v428_v14  ;;  %1575 = vst [vmem:[%s2192_s24 + $0x680] sm:$0xff] %v1191_v21  ;;  %1576 = vst [vmem:[%s2192_s24 + $0x688] sm:$0xff] %v1192_v22  ;;  %v814_v36 = vmul.f32 %v2160_v1, %v429_v19  ;;  %v450_v18 = vld [vmem:[%s2153_s13 + $0x768] sm:$0xff]  ;;  %v451_v19 = vld [vmem:[%s2153_s13 + $0x770] sm:$0xff] }
  0xd0   : > { %v1196_v34 = vadd.f32 %v2162_v2, %v811_v23  ;;  %v1197_v35 = vadd.f32 %v2162_v2, %v812_v24  ;;  %v815_v37 = vmul.f32 %v2160_v1, %v430_v20  ;;  %1577 = vst [vmem:[%s2192_s24 + $0x690] sm:$0xff] %v1193_v28  ;;  %1578 = vst [vmem:[%s2192_s24 + $0x698] sm:$0xff] %v1194_v29  ;;  %v452_v24 = vld [vmem:[%s2153_s13 + $0x778] sm:$0xff]  ;;  %v453_v29 = vld [vmem:[%s2153_s13 + $0x780] sm:$0xff] }
  0xd1   : > { %1579 = vst [vmem:[%s2192_s24 + $0x6a0] sm:$0xff] %v1195_v30  ;;  %v1198_v39 = vadd.f32 %v2162_v2, %v813_v31  ;;  %v816_v40 = vmul.f32 %v2160_v1, %v431_v25  ;;  %v817_v41 = vmul.f32 %v2160_v1, %v432_v26  ;;  %v818_v42 = vmul.f32 %v2160_v1, %v433_v27  ;;  %v454_v30 = vld [vmem:[%s2153_s13 + $0x788] sm:$0xff] }
  0xd2   : > { %1580 = vst [vmem:[%s2192_s24 + $0x6a8] sm:$0xff] %v1196_v34  ;;  %1581 = vst [vmem:[%s2192_s24 + $0x6b0] sm:$0xff] %v1197_v35  ;;  %v1199_v45 = vadd.f32 %v2162_v2, %v814_v36  ;;  %v1200_v46 = vadd.f32 %v2162_v2, %v815_v37  ;;  %v819_v47 = vmul.f32 %v2160_v1, %v434_v32  ;;  %v455_v35 = vld [vmem:[%s2153_s13 + $0x790] sm:$0xff]  ;;  %v456_v36 = vld [vmem:[%s2153_s13 + $0x798] sm:$0xff] }
  0xd3   : > { %v820_v48 = vmul.f32 %v2160_v1, %v435_v33  ;;  %1582 = vst [vmem:[%s2192_s24 + $0x6b8] sm:$0xff] %v1198_v39  ;;  %v1201_v52 = vadd.f32 %v2162_v2, %v816_v40  ;;  %v1202_v53 = vadd.f32 %v2162_v2, %v817_v41  ;;  %v1203_v54 = vadd.f32 %v2162_v2, %v818_v42  ;;  %v457_v37 = vld [vmem:[%s2153_s13 + $0x7a0] sm:$0xff]  ;;  %v458_v42 = vld [vmem:[%s2153_s13 + $0x7a8] sm:$0xff] }
  0xd4   : > { %v821_v55 = vmul.f32 %v2160_v1, %v436_v38  ;;  %1583 = vst [vmem:[%s2192_s24 + $0x6c0] sm:$0xff] %v1199_v45  ;;  %1584 = vst [vmem:[%s2192_s24 + $0x6c8] sm:$0xff] %v1200_v46  ;;  %v1204_v58 = vadd.f32 %v2162_v2, %v819_v47  ;;  %v822_v60 = vmul.f32 %v2160_v1, %v437_v43  ;;  %v459_v43 = vld [vmem:[%s2153_s13 + $0x7b0] sm:$0xff] }
  0xd5   : > { %v1205_v59 = vadd.f32 %v2162_v2, %v820_v48  ;;  %v823_v61 = vmul.f32 %v2160_v1, %v438_v44  ;;  %1585 = vst [vmem:[%s2192_s24 + $0x6d0] sm:$0xff] %v1201_v52  ;;  %1586 = vst [vmem:[%s2192_s24 + $0x6d8] sm:$0xff] %v1202_v53  ;;  %v824_v0 = vmul.f32 %v2160_v1, %v439_v49  ;;  %v460_v48 = vld [vmem:[%s2153_s13 + $0x7b8] sm:$0xff]  ;;  %v461_v53 = vld [vmem:[%s2153_s13 + $0x7c0] sm:$0xff] }
  0xd6   : > { %1587 = vst [vmem:[%s2192_s24 + $0x6e0] sm:$0xff] %v1203_v54  ;;  %v1206_v63 = vadd.f32 %v2162_v2, %v821_v55  ;;  %v825_v3 = vmul.f32 %v2160_v1, %v440_v50  ;;  %v826_v4 = vmul.f32 %v2160_v1, %v441_v51  ;;  %1588 = vst [vmem:[%s2192_s24 + $0x6e8] sm:$0xff] %v1204_v58  ;;  %v462_v54 = vld [vmem:[%s2153_s13 + $0x7c8] sm:$0xff] }
  0xd7   : > { %1589 = vst [vmem:[%s2192_s24 + $0x6f0] sm:$0xff] %v1205_v59  ;;  %v1207_v7 = vadd.f32 %v2162_v2, %v822_v60  ;;  %v1208_v8 = vadd.f32 %v2162_v2, %v823_v61  ;;  %v827_v9 = vmul.f32 %v2160_v1, %v442_v56  ;;  %v828_v10 = vmul.f32 %v2160_v1, %v443_v57  ;;  %v463_v59 = vld [vmem:[%s2153_s13 + $0x7d0] sm:$0xff]  ;;  %v464_v60 = vld [vmem:[%s2153_s13 + $0x7d8] sm:$0xff]  ;;  %v465_v61 = vld [vmem:[%s2153_s13 + $0x7e0] sm:$0xff] }
  0xd8   : > { %1590 = vst [vmem:[%s2192_s24 + $0x6f8] sm:$0xff] %v1206_v63  ;;  %v1209_v14 = vadd.f32 %v2162_v2, %v824_v0  ;;  %v1210_v15 = vadd.f32 %v2162_v2, %v825_v3  ;;  %v1211_v16 = vadd.f32 %v2162_v2, %v826_v4  ;;  %v829_v17 = vmul.f32 %v2160_v1, %v444_v62  ;;  %v466_v4 = vld [vmem:[%s2153_s13 + $0x7e8] sm:$0xff] }
  0xd9   : > { %1591 = vst [vmem:[%s2192_s24 + $0x700] sm:$0xff] %v1207_v7  ;;  %1592 = vst [vmem:[%s2192_s24 + $0x708] sm:$0xff] %v1208_v8  ;;  %v1212_v20 = vadd.f32 %v2162_v2, %v827_v9  ;;  %v1213_v21 = vadd.f32 %v2162_v2, %v828_v10  ;;  %v830_v22 = vmul.f32 %v2160_v1, %v445_v5  ;;  %v467_v5 = vld [vmem:[%s2153_s13 + $0x7f0] sm:$0xff]  ;;  %v468_v10 = vld [vmem:[%s2153_s13 + $0x7f8] sm:$0xff] }
  0xda   : > { %v831_v23 = vmul.f32 %v2160_v1, %v446_v6  ;;  %1593 = vst [vmem:[%s2192_s24 + $0x710] sm:$0xff] %v1209_v14  ;;  %1594 = vst [vmem:[%s2192_s24 + $0x718] sm:$0xff] %v1210_v15  ;;  %v1214_v25 = vadd.f32 %v2162_v2, %v829_v17  ;;  %v832_v26 = vmul.f32 %v2160_v1, %v447_v11  ;;  %v469_v15 = vld [vmem:[%s2153_s13 + $0x800] sm:$0xff] }
  0xdb   : > { %1595 = vst [vmem:[%s2192_s24 + $0x720] sm:$0xff] %v1211_v16  ;;  %v833_v27 = vmul.f32 %v2160_v1, %v448_v12  ;;  %v834_v28 = vmul.f32 %v2160_v1, %v449_v13  ;;  %1596 = vst [vmem:[%s2192_s24 + $0x728] sm:$0xff] %v1212_v20  ;;  %v1215_v31 = vadd.f32 %v2162_v2, %v830_v22  ;;  %v470_v16 = vld [vmem:[%s2153_s13 + $0x808] sm:$0xff]  ;;  %v472_v22 = vld [vmem:[%s2153_s13 + $0x818] sm:$0xff] }
  0xdc   : > { %1597 = vst [vmem:[%s2192_s24 + $0x730] sm:$0xff] %v1213_v21  ;;  %v1216_v32 = vadd.f32 %v2162_v2, %v831_v23  ;;  %v835_v33 = vmul.f32 %v2160_v1, %v450_v18  ;;  %v836_v34 = vmul.f32 %v2160_v1, %v451_v19  ;;  %1598 = vst [vmem:[%s2192_s24 + $0x738] sm:$0xff] %v1214_v25  ;;  %v471_v21 = vld [vmem:[%s2153_s13 + $0x810] sm:$0xff]  ;;  %v473_v23 = vld [vmem:[%s2153_s13 + $0x820] sm:$0xff] }
  0xdd   : > { %v1217_v38 = vadd.f32 %v2162_v2, %v832_v26  ;;  %v1218_v39 = vadd.f32 %v2162_v2, %v833_v27  ;;  %v1219_v40 = vadd.f32 %v2162_v2, %v834_v28  ;;  %v837_v41 = vmul.f32 %v2160_v1, %v452_v24  ;;  %1599 = vst [vmem:[%s2192_s24 + $0x740] sm:$0xff] %v1215_v31  ;;  %v474_v28 = vld [vmem:[%s2153_s13 + $0x828] sm:$0xff] }
  0xde   : > { %1600 = vst [vmem:[%s2192_s24 + $0x748] sm:$0xff] %v1216_v32  ;;  %v1220_v44 = vadd.f32 %v2162_v2, %v835_v33  ;;  %v1221_v45 = vadd.f32 %v2162_v2, %v836_v34  ;;  %v838_v46 = vmul.f32 %v2160_v1, %v453_v29  ;;  %v839_v47 = vmul.f32 %v2160_v1, %v454_v30  ;;  %v475_v29 = vld [vmem:[%s2153_s13 + $0x830] sm:$0xff]  ;;  %v476_v34 = vld [vmem:[%s2153_s13 + $0x838] sm:$0xff] }
  0xdf   : > { %1601 = vst [vmem:[%s2192_s24 + $0x750] sm:$0xff] %v1217_v38  ;;  %1602 = vst [vmem:[%s2192_s24 + $0x758] sm:$0xff] %v1218_v39  ;;  %v1222_v49 = vadd.f32 %v2162_v2, %v837_v41  ;;  %v840_v50 = vmul.f32 %v2160_v1, %v455_v35  ;;  %v841_v51 = vmul.f32 %v2160_v1, %v456_v36  ;;  %v477_v39 = vld [vmem:[%s2153_s13 + $0x840] sm:$0xff] }
  0xe0   : > { %1603 = vst [vmem:[%s2192_s24 + $0x760] sm:$0xff] %v1219_v40  ;;  %v842_v52 = vmul.f32 %v2160_v1, %v457_v37  ;;  %1604 = vst [vmem:[%s2192_s24 + $0x768] sm:$0xff] %v1220_v44  ;;  %v1223_v55 = vadd.f32 %v2162_v2, %v838_v46  ;;  %v1224_v56 = vadd.f32 %v2162_v2, %v839_v47  ;;  %v478_v40 = vld [vmem:[%s2153_s13 + $0x848] sm:$0xff]  ;;  %v480_v46 = vld [vmem:[%s2153_s13 + $0x858] sm:$0xff] }
  0xe1   : > { %1605 = vst [vmem:[%s2192_s24 + $0x770] sm:$0xff] %v1221_v45  ;;  %v843_v57 = vmul.f32 %v2160_v1, %v458_v42  ;;  %v844_v58 = vmul.f32 %v2160_v1, %v459_v43  ;;  %1606 = vst [vmem:[%s2192_s24 + $0x778] sm:$0xff] %v1222_v49  ;;  %v1225_v62 = vadd.f32 %v2162_v2, %v840_v50  ;;  %v479_v45 = vld [vmem:[%s2153_s13 + $0x850] sm:$0xff]  ;;  %v481_v47 = vld [vmem:[%s2153_s13 + $0x860] sm:$0xff] }
  0xe2   : > { %v1226_v63 = vadd.f32 %v2162_v2, %v841_v51  ;;  %v1227_v0 = vadd.f32 %v2162_v2, %v842_v52  ;;  %v845_v3 = vmul.f32 %v2160_v1, %v460_v48  ;;  %1607 = vst [vmem:[%s2192_s24 + $0x780] sm:$0xff] %v1223_v55  ;;  %1608 = vst [vmem:[%s2192_s24 + $0x788] sm:$0xff] %v1224_v56  ;;  %v482_v52 = vld [vmem:[%s2153_s13 + $0x868] sm:$0xff] }
  0xe3   : > { %v1228_v6 = vadd.f32 %v2162_v2, %v843_v57  ;;  %v1229_v7 = vadd.f32 %v2162_v2, %v844_v58  ;;  %v846_v8 = vmul.f32 %v2160_v1, %v461_v53  ;;  %v847_v9 = vmul.f32 %v2160_v1, %v462_v54  ;;  %1609 = vst [vmem:[%s2192_s24 + $0x790] sm:$0xff] %v1225_v62  ;;  %v483_v53 = vld [vmem:[%s2153_s13 + $0x870] sm:$0xff]  ;;  %v484_v58 = vld [vmem:[%s2153_s13 + $0x878] sm:$0xff] }
  0xe4   : > { %1610 = vst [vmem:[%s2192_s24 + $0x798] sm:$0xff] %v1226_v63  ;;  %1611 = vst [vmem:[%s2192_s24 + $0x7a0] sm:$0xff] %v1227_v0  ;;  %v1230_v11 = vadd.f32 %v2162_v2, %v845_v3  ;;  %v848_v12 = vmul.f32 %v2160_v1, %v463_v59  ;;  %v849_v13 = vmul.f32 %v2160_v1, %v464_v60  ;;  %v485_v63 = vld [vmem:[%s2153_s13 + $0x880] sm:$0xff]  ;;  %v486_v0 = vld [vmem:[%s2153_s13 + $0x888] sm:$0xff] }
  0xe5   : > { %v850_v14 = vmul.f32 %v2160_v1, %v465_v61  ;;  %1612 = vst [vmem:[%s2192_s24 + $0x7a8] sm:$0xff] %v1228_v6  ;;  %1613 = vst [vmem:[%s2192_s24 + $0x7b0] sm:$0xff] %v1229_v7  ;;  %v1231_v17 = vadd.f32 %v2162_v2, %v846_v8  ;;  %v1232_v18 = vadd.f32 %v2162_v2, %v847_v9  ;;  %v487_v7 = vld [vmem:[%s2153_s13 + $0x890] sm:$0xff]  ;;  %v488_v8 = vld [vmem:[%s2153_s13 + $0x898] sm:$0xff] }
  0xe6   : > { %v851_v19 = vmul.f32 %v2160_v1, %v466_v4  ;;  %v852_v20 = vmul.f32 %v2160_v1, %v467_v5  ;;  %1614 = vst [vmem:[%s2192_s24 + $0x7b8] sm:$0xff] %v1230_v11  ;;  %v1233_v24 = vadd.f32 %v2162_v2, %v848_v12  ;;  %v1234_v25 = vadd.f32 %v2162_v2, %v849_v13  ;;  %v489_v9 = vld [vmem:[%s2153_s13 + $0x8a0] sm:$0xff] }
  0xe7   : > { %v1235_v26 = vadd.f32 %v2162_v2, %v850_v14  ;;  %v853_v27 = vmul.f32 %v2160_v1, %v468_v10  ;;  %1615 = vst [vmem:[%s2192_s24 + $0x7c0] sm:$0xff] %v1231_v17  ;;  %1616 = vst [vmem:[%s2192_s24 + $0x7c8] sm:$0xff] %v1232_v18  ;;  %v854_v32 = vmul.f32 %v2160_v1, %v469_v15  ;;  %v490_v14 = vld [vmem:[%s2153_s13 + $0x8a8] sm:$0xff]  ;;  %v491_v15 = vld [vmem:[%s2153_s13 + $0x8b0] sm:$0xff] }
  0xe8   : > { %v1236_v30 = vadd.f32 %v2162_v2, %v851_v19  ;;  %v1237_v31 = vadd.f32 %v2162_v2, %v852_v20  ;;  %v855_v33 = vmul.f32 %v2160_v1, %v470_v16  ;;  %1617 = vst [vmem:[%s2192_s24 + $0x7d0] sm:$0xff] %v1233_v24  ;;  %1618 = vst [vmem:[%s2192_s24 + $0x7d8] sm:$0xff] %v1234_v25  ;;  %v492_v20 = vld [vmem:[%s2153_s13 + $0x8b8] sm:$0xff]  ;;  %v493_v25 = vld [vmem:[%s2153_s13 + $0x8c0] sm:$0xff] }
  0xe9   : > { %1619 = vst [vmem:[%s2192_s24 + $0x7e0] sm:$0xff] %v1235_v26  ;;  %v1238_v35 = vadd.f32 %v2162_v2, %v853_v27  ;;  %v856_v36 = vmul.f32 %v2160_v1, %v471_v21  ;;  %v857_v37 = vmul.f32 %v2160_v1, %v472_v22  ;;  %v858_v38 = vmul.f32 %v2160_v1, %v473_v23  ;;  %v494_v26 = vld [vmem:[%s2153_s13 + $0x8c8] sm:$0xff] }
  0xea   : > { %1620 = vst [vmem:[%s2192_s24 + $0x7e8] sm:$0xff] %v1236_v30  ;;  %1621 = vst [vmem:[%s2192_s24 + $0x7f0] sm:$0xff] %v1237_v31  ;;  %v1239_v41 = vadd.f32 %v2162_v2, %v854_v32  ;;  %v1240_v42 = vadd.f32 %v2162_v2, %v855_v33  ;;  %v859_v43 = vmul.f32 %v2160_v1, %v474_v28  ;;  %v495_v31 = vld [vmem:[%s2153_s13 + $0x8d0] sm:$0xff]  ;;  %v496_v32 = vld [vmem:[%s2153_s13 + $0x8d8] sm:$0xff] }
  0xeb   : > { %v860_v44 = vmul.f32 %v2160_v1, %v475_v29  ;;  %1622 = vst [vmem:[%s2192_s24 + $0x7f8] sm:$0xff] %v1238_v35  ;;  %v1241_v48 = vadd.f32 %v2162_v2, %v856_v36  ;;  %v1242_v49 = vadd.f32 %v2162_v2, %v857_v37  ;;  %v1243_v50 = vadd.f32 %v2162_v2, %v858_v38  ;;  %v497_v33 = vld [vmem:[%s2153_s13 + $0x8e0] sm:$0xff]  ;;  %v498_v38 = vld [vmem:[%s2153_s13 + $0x8e8] sm:$0xff] }
  0xec   : > { %v861_v51 = vmul.f32 %v2160_v1, %v476_v34  ;;  %1623 = vst [vmem:[%s2192_s24 + $0x800] sm:$0xff] %v1239_v41  ;;  %1624 = vst [vmem:[%s2192_s24 + $0x808] sm:$0xff] %v1240_v42  ;;  %v1244_v54 = vadd.f32 %v2162_v2, %v859_v43  ;;  %v862_v56 = vmul.f32 %v2160_v1, %v477_v39  ;;  %v499_v39 = vld [vmem:[%s2153_s13 + $0x8f0] sm:$0xff] }
  0xed   : > { %v1245_v55 = vadd.f32 %v2162_v2, %v860_v44  ;;  %v863_v57 = vmul.f32 %v2160_v1, %v478_v40  ;;  %1625 = vst [vmem:[%s2192_s24 + $0x810] sm:$0xff] %v1241_v48  ;;  %1626 = vst [vmem:[%s2192_s24 + $0x818] sm:$0xff] %v1242_v49  ;;  %v864_v60 = vmul.f32 %v2160_v1, %v479_v45  ;;  %v500_v44 = vld [vmem:[%s2153_s13 + $0x8f8] sm:$0xff]  ;;  %v501_v49 = vld [vmem:[%s2153_s13 + $0x900] sm:$0xff] }
  0xee   : > { %1627 = vst [vmem:[%s2192_s24 + $0x820] sm:$0xff] %v1243_v50  ;;  %v1246_v59 = vadd.f32 %v2162_v2, %v861_v51  ;;  %v865_v61 = vmul.f32 %v2160_v1, %v480_v46  ;;  %v866_v62 = vmul.f32 %v2160_v1, %v481_v47  ;;  %1628 = vst [vmem:[%s2192_s24 + $0x828] sm:$0xff] %v1244_v54  ;;  %v502_v50 = vld [vmem:[%s2153_s13 + $0x908] sm:$0xff] }
  0xef   : > { %1629 = vst [vmem:[%s2192_s24 + $0x830] sm:$0xff] %v1245_v55  ;;  %v1247_v3 = vadd.f32 %v2162_v2, %v862_v56  ;;  %v1248_v4 = vadd.f32 %v2162_v2, %v863_v57  ;;  %v867_v5 = vmul.f32 %v2160_v1, %v482_v52  ;;  %v868_v6 = vmul.f32 %v2160_v1, %v483_v53  ;;  %v503_v55 = vld [vmem:[%s2153_s13 + $0x910] sm:$0xff]  ;;  %v504_v56 = vld [vmem:[%s2153_s13 + $0x918] sm:$0xff]  ;;  %v505_v57 = vld [vmem:[%s2153_s13 + $0x920] sm:$0xff] }
  0xf0   : > { %1630 = vst [vmem:[%s2192_s24 + $0x838] sm:$0xff] %v1246_v59  ;;  %v1249_v10 = vadd.f32 %v2162_v2, %v864_v60  ;;  %v1250_v11 = vadd.f32 %v2162_v2, %v865_v61  ;;  %v1251_v12 = vadd.f32 %v2162_v2, %v866_v62  ;;  %v869_v13 = vmul.f32 %v2160_v1, %v484_v58  ;;  %v506_v62 = vld [vmem:[%s2153_s13 + $0x928] sm:$0xff] }
  0xf1   : > { %1631 = vst [vmem:[%s2192_s24 + $0x840] sm:$0xff] %v1247_v3  ;;  %1632 = vst [vmem:[%s2192_s24 + $0x848] sm:$0xff] %v1248_v4  ;;  %v1252_v16 = vadd.f32 %v2162_v2, %v867_v5  ;;  %v1253_v17 = vadd.f32 %v2162_v2, %v868_v6  ;;  %v870_v18 = vmul.f32 %v2160_v1, %v485_v63  ;;  %v507_v63 = vld [vmem:[%s2153_s13 + $0x930] sm:$0xff]  ;;  %v508_v6 = vld [vmem:[%s2153_s13 + $0x938] sm:$0xff] }
  0xf2   : > { %v871_v19 = vmul.f32 %v2160_v1, %v486_v0  ;;  %1633 = vst [vmem:[%s2192_s24 + $0x850] sm:$0xff] %v1249_v10  ;;  %1634 = vst [vmem:[%s2192_s24 + $0x858] sm:$0xff] %v1250_v11  ;;  %v1254_v21 = vadd.f32 %v2162_v2, %v869_v13  ;;  %v872_v22 = vmul.f32 %v2160_v1, %v487_v7  ;;  %v509_v11 = vld [vmem:[%s2153_s13 + $0x940] sm:$0xff] }
  0xf3   : > { %1635 = vst [vmem:[%s2192_s24 + $0x860] sm:$0xff] %v1251_v12  ;;  %v873_v23 = vmul.f32 %v2160_v1, %v488_v8  ;;  %v874_v24 = vmul.f32 %v2160_v1, %v489_v9  ;;  %1636 = vst [vmem:[%s2192_s24 + $0x868] sm:$0xff] %v1252_v16  ;;  %v1255_v27 = vadd.f32 %v2162_v2, %v870_v18  ;;  %v510_v12 = vld [vmem:[%s2153_s13 + $0x948] sm:$0xff]  ;;  %v512_v18 = vld [vmem:[%s2153_s13 + $0x958] sm:$0xff] }
  0xf4   : > { %1637 = vst [vmem:[%s2192_s24 + $0x870] sm:$0xff] %v1253_v17  ;;  %v1256_v28 = vadd.f32 %v2162_v2, %v871_v19  ;;  %v875_v29 = vmul.f32 %v2160_v1, %v490_v14  ;;  %v876_v30 = vmul.f32 %v2160_v1, %v491_v15  ;;  %1638 = vst [vmem:[%s2192_s24 + $0x878] sm:$0xff] %v1254_v21  ;;  %v511_v17 = vld [vmem:[%s2153_s13 + $0x950] sm:$0xff]  ;;  %v513_v19 = vld [vmem:[%s2153_s13 + $0x960] sm:$0xff] }
  0xf5   : > { %v1257_v34 = vadd.f32 %v2162_v2, %v872_v22  ;;  %v1258_v35 = vadd.f32 %v2162_v2, %v873_v23  ;;  %v1259_v36 = vadd.f32 %v2162_v2, %v874_v24  ;;  %v877_v37 = vmul.f32 %v2160_v1, %v492_v20  ;;  %1639 = vst [vmem:[%s2192_s24 + $0x880] sm:$0xff] %v1255_v27  ;;  %v514_v24 = vld [vmem:[%s2153_s13 + $0x968] sm:$0xff] }
  0xf6   : > { %1640 = vst [vmem:[%s2192_s24 + $0x888] sm:$0xff] %v1256_v28  ;;  %v1260_v40 = vadd.f32 %v2162_v2, %v875_v29  ;;  %v1261_v41 = vadd.f32 %v2162_v2, %v876_v30  ;;  %v878_v42 = vmul.f32 %v2160_v1, %v493_v25  ;;  %v879_v43 = vmul.f32 %v2160_v1, %v494_v26  ;;  %v515_v25 = vld [vmem:[%s2153_s13 + $0x970] sm:$0xff]  ;;  %v516_v30 = vld [vmem:[%s2153_s13 + $0x978] sm:$0xff] }
  0xf7   : > { %1641 = vst [vmem:[%s2192_s24 + $0x890] sm:$0xff] %v1257_v34  ;;  %1642 = vst [vmem:[%s2192_s24 + $0x898] sm:$0xff] %v1258_v35  ;;  %v1262_v45 = vadd.f32 %v2162_v2, %v877_v37  ;;  %v880_v46 = vmul.f32 %v2160_v1, %v495_v31  ;;  %v881_v47 = vmul.f32 %v2160_v1, %v496_v32  ;;  %v517_v35 = vld [vmem:[%s2153_s13 + $0x980] sm:$0xff] }
  0xf8   : > { %1643 = vst [vmem:[%s2192_s24 + $0x8a0] sm:$0xff] %v1259_v36  ;;  %v882_v48 = vmul.f32 %v2160_v1, %v497_v33  ;;  %1644 = vst [vmem:[%s2192_s24 + $0x8a8] sm:$0xff] %v1260_v40  ;;  %v1263_v51 = vadd.f32 %v2162_v2, %v878_v42  ;;  %v1264_v52 = vadd.f32 %v2162_v2, %v879_v43  ;;  %v518_v36 = vld [vmem:[%s2153_s13 + $0x988] sm:$0xff]  ;;  %v520_v42 = vld [vmem:[%s2153_s13 + $0x998] sm:$0xff] }
  0xf9   : > { %1645 = vst [vmem:[%s2192_s24 + $0x8b0] sm:$0xff] %v1261_v41  ;;  %v883_v53 = vmul.f32 %v2160_v1, %v498_v38  ;;  %v884_v54 = vmul.f32 %v2160_v1, %v499_v39  ;;  %1646 = vst [vmem:[%s2192_s24 + $0x8b8] sm:$0xff] %v1262_v45  ;;  %v1265_v58 = vadd.f32 %v2162_v2, %v880_v46  ;;  %v519_v41 = vld [vmem:[%s2153_s13 + $0x990] sm:$0xff]  ;;  %v521_v43 = vld [vmem:[%s2153_s13 + $0x9a0] sm:$0xff] }
  0xfa   : > { %v1266_v59 = vadd.f32 %v2162_v2, %v881_v47  ;;  %v1267_v60 = vadd.f32 %v2162_v2, %v882_v48  ;;  %v885_v61 = vmul.f32 %v2160_v1, %v500_v44  ;;  %1647 = vst [vmem:[%s2192_s24 + $0x8c0] sm:$0xff] %v1263_v51  ;;  %1648 = vst [vmem:[%s2192_s24 + $0x8c8] sm:$0xff] %v1264_v52  ;;  %v522_v48 = vld [vmem:[%s2153_s13 + $0x9a8] sm:$0xff] }
  0xfb   : > { %v1268_v0 = vadd.f32 %v2162_v2, %v883_v53  ;;  %v1269_v3 = vadd.f32 %v2162_v2, %v884_v54  ;;  %v886_v4 = vmul.f32 %v2160_v1, %v501_v49  ;;  %v887_v5 = vmul.f32 %v2160_v1, %v502_v50  ;;  %1649 = vst [vmem:[%s2192_s24 + $0x8d0] sm:$0xff] %v1265_v58  ;;  %v523_v49 = vld [vmem:[%s2153_s13 + $0x9b0] sm:$0xff]  ;;  %v524_v54 = vld [vmem:[%s2153_s13 + $0x9b8] sm:$0xff] }
  0xfc   : > { %1650 = vst [vmem:[%s2192_s24 + $0x8d8] sm:$0xff] %v1266_v59  ;;  %1651 = vst [vmem:[%s2192_s24 + $0x8e0] sm:$0xff] %v1267_v60  ;;  %v1270_v7 = vadd.f32 %v2162_v2, %v885_v61  ;;  %v888_v8 = vmul.f32 %v2160_v1, %v503_v55  ;;  %v889_v9 = vmul.f32 %v2160_v1, %v504_v56  ;;  %v525_v59 = vld [vmem:[%s2153_s13 + $0x9c0] sm:$0xff]  ;;  %v526_v60 = vld [vmem:[%s2153_s13 + $0x9c8] sm:$0xff] }
  0xfd   : > { %v890_v10 = vmul.f32 %v2160_v1, %v505_v57  ;;  %1652 = vst [vmem:[%s2192_s24 + $0x8e8] sm:$0xff] %v1268_v0  ;;  %1653 = vst [vmem:[%s2192_s24 + $0x8f0] sm:$0xff] %v1269_v3  ;;  %v1271_v13 = vadd.f32 %v2162_v2, %v886_v4  ;;  %v1272_v14 = vadd.f32 %v2162_v2, %v887_v5  ;;  %v527_v3 = vld [vmem:[%s2153_s13 + $0x9d0] sm:$0xff]  ;;  %v528_v4 = vld [vmem:[%s2153_s13 + $0x9d8] sm:$0xff] }
  0xfe   : > { %v891_v15 = vmul.f32 %v2160_v1, %v506_v62  ;;  %v892_v16 = vmul.f32 %v2160_v1, %v507_v63  ;;  %1654 = vst [vmem:[%s2192_s24 + $0x8f8] sm:$0xff] %v1270_v7  ;;  %v1273_v20 = vadd.f32 %v2162_v2, %v888_v8  ;;  %v1274_v21 = vadd.f32 %v2162_v2, %v889_v9  ;;  %v529_v5 = vld [vmem:[%s2153_s13 + $0x9e0] sm:$0xff] }
  0xff   : > { %v1275_v22 = vadd.f32 %v2162_v2, %v890_v10  ;;  %v893_v23 = vmul.f32 %v2160_v1, %v508_v6  ;;  %1655 = vst [vmem:[%s2192_s24 + $0x900] sm:$0xff] %v1271_v13  ;;  %1656 = vst [vmem:[%s2192_s24 + $0x908] sm:$0xff] %v1272_v14  ;;  %v894_v28 = vmul.f32 %v2160_v1, %v509_v11  ;;  %v530_v10 = vld [vmem:[%s2153_s13 + $0x9e8] sm:$0xff]  ;;  %v531_v11 = vld [vmem:[%s2153_s13 + $0x9f0] sm:$0xff] }
 0x100   : > { %v1276_v26 = vadd.f32 %v2162_v2, %v891_v15  ;;  %v1277_v27 = vadd.f32 %v2162_v2, %v892_v16  ;;  %v895_v29 = vmul.f32 %v2160_v1, %v510_v12  ;;  %1657 = vst [vmem:[%s2192_s24 + $0x910] sm:$0xff] %v1273_v20  ;;  %1658 = vst [vmem:[%s2192_s24 + $0x918] sm:$0xff] %v1274_v21  ;;  %v532_v16 = vld [vmem:[%s2153_s13 + $0x9f8] sm:$0xff]  ;;  %v533_v21 = vld [vmem:[%s2153_s13 + $0xa00] sm:$0xff] }
 0x101   : > { %1659 = vst [vmem:[%s2192_s24 + $0x920] sm:$0xff] %v1275_v22  ;;  %v1278_v31 = vadd.f32 %v2162_v2, %v893_v23  ;;  %v896_v32 = vmul.f32 %v2160_v1, %v511_v17  ;;  %v897_v33 = vmul.f32 %v2160_v1, %v512_v18  ;;  %v898_v34 = vmul.f32 %v2160_v1, %v513_v19  ;;  %v534_v22 = vld [vmem:[%s2153_s13 + $0xa08] sm:$0xff] }
 0x102   : > { %1660 = vst [vmem:[%s2192_s24 + $0x928] sm:$0xff] %v1276_v26  ;;  %1661 = vst [vmem:[%s2192_s24 + $0x930] sm:$0xff] %v1277_v27  ;;  %v1279_v37 = vadd.f32 %v2162_v2, %v894_v28  ;;  %v1280_v38 = vadd.f32 %v2162_v2, %v895_v29  ;;  %v899_v39 = vmul.f32 %v2160_v1, %v514_v24  ;;  %v535_v27 = vld [vmem:[%s2153_s13 + $0xa10] sm:$0xff]  ;;  %v536_v28 = vld [vmem:[%s2153_s13 + $0xa18] sm:$0xff] }
 0x103   : > { %v900_v40 = vmul.f32 %v2160_v1, %v515_v25  ;;  %1662 = vst [vmem:[%s2192_s24 + $0x938] sm:$0xff] %v1278_v31  ;;  %v1281_v44 = vadd.f32 %v2162_v2, %v896_v32  ;;  %v1282_v45 = vadd.f32 %v2162_v2, %v897_v33  ;;  %v1283_v46 = vadd.f32 %v2162_v2, %v898_v34  ;;  %v537_v29 = vld [vmem:[%s2153_s13 + $0xa20] sm:$0xff]  ;;  %v538_v34 = vld [vmem:[%s2153_s13 + $0xa28] sm:$0xff] }
 0x104   : > { %v901_v47 = vmul.f32 %v2160_v1, %v516_v30  ;;  %1663 = vst [vmem:[%s2192_s24 + $0x940] sm:$0xff] %v1279_v37  ;;  %1664 = vst [vmem:[%s2192_s24 + $0x948] sm:$0xff] %v1280_v38  ;;  %v1284_v50 = vadd.f32 %v2162_v2, %v899_v39  ;;  %v902_v52 = vmul.f32 %v2160_v1, %v517_v35  ;;  %v539_v35 = vld [vmem:[%s2153_s13 + $0xa30] sm:$0xff] }
 0x105   : > { %v1285_v51 = vadd.f32 %v2162_v2, %v900_v40  ;;  %v903_v53 = vmul.f32 %v2160_v1, %v518_v36  ;;  %1665 = vst [vmem:[%s2192_s24 + $0x950] sm:$0xff] %v1281_v44  ;;  %1666 = vst [vmem:[%s2192_s24 + $0x958] sm:$0xff] %v1282_v45  ;;  %v904_v56 = vmul.f32 %v2160_v1, %v519_v41  ;;  %v540_v40 = vld [vmem:[%s2153_s13 + $0xa38] sm:$0xff]  ;;  %v541_v45 = vld [vmem:[%s2153_s13 + $0xa40] sm:$0xff] }
 0x106   : > { %1667 = vst [vmem:[%s2192_s24 + $0x960] sm:$0xff] %v1283_v46  ;;  %v1286_v55 = vadd.f32 %v2162_v2, %v901_v47  ;;  %v905_v57 = vmul.f32 %v2160_v1, %v520_v42  ;;  %v906_v58 = vmul.f32 %v2160_v1, %v521_v43  ;;  %1668 = vst [vmem:[%s2192_s24 + $0x968] sm:$0xff] %v1284_v50  ;;  %v542_v46 = vld [vmem:[%s2153_s13 + $0xa48] sm:$0xff] }
 0x107   : > { %1669 = vst [vmem:[%s2192_s24 + $0x970] sm:$0xff] %v1285_v51  ;;  %v1287_v61 = vadd.f32 %v2162_v2, %v902_v52  ;;  %v1288_v62 = vadd.f32 %v2162_v2, %v903_v53  ;;  %v907_v63 = vmul.f32 %v2160_v1, %v522_v48  ;;  %v908_v0 = vmul.f32 %v2160_v1, %v523_v49  ;;  %v543_v51 = vld [vmem:[%s2153_s13 + $0xa50] sm:$0xff]  ;;  %v544_v52 = vld [vmem:[%s2153_s13 + $0xa58] sm:$0xff]  ;;  %v545_v53 = vld [vmem:[%s2153_s13 + $0xa60] sm:$0xff] }
 0x108   : > { %1670 = vst [vmem:[%s2192_s24 + $0x978] sm:$0xff] %v1286_v55  ;;  %v1289_v6 = vadd.f32 %v2162_v2, %v904_v56  ;;  %v1290_v7 = vadd.f32 %v2162_v2, %v905_v57  ;;  %v1291_v8 = vadd.f32 %v2162_v2, %v906_v58  ;;  %v909_v9 = vmul.f32 %v2160_v1, %v524_v54  ;;  %v546_v58 = vld [vmem:[%s2153_s13 + $0xa68] sm:$0xff] }
 0x109   : > { %1671 = vst [vmem:[%s2192_s24 + $0x980] sm:$0xff] %v1287_v61  ;;  %1672 = vst [vmem:[%s2192_s24 + $0x988] sm:$0xff] %v1288_v62  ;;  %v1292_v12 = vadd.f32 %v2162_v2, %v907_v63  ;;  %v1293_v13 = vadd.f32 %v2162_v2, %v908_v0  ;;  %v910_v14 = vmul.f32 %v2160_v1, %v525_v59  ;;  %v547_v59 = vld [vmem:[%s2153_s13 + $0xa70] sm:$0xff]  ;;  %v548_v0 = vld [vmem:[%s2153_s13 + $0xa78] sm:$0xff] }
 0x10a   : > { %v911_v15 = vmul.f32 %v2160_v1, %v526_v60  ;;  %1673 = vst [vmem:[%s2192_s24 + $0x990] sm:$0xff] %v1289_v6  ;;  %1674 = vst [vmem:[%s2192_s24 + $0x998] sm:$0xff] %v1290_v7  ;;  %v1294_v17 = vadd.f32 %v2162_v2, %v909_v9  ;;  %v912_v18 = vmul.f32 %v2160_v1, %v527_v3  ;;  %v549_v7 = vld [vmem:[%s2153_s13 + $0xa80] sm:$0xff] }
 0x10b   : > { %1675 = vst [vmem:[%s2192_s24 + $0x9a0] sm:$0xff] %v1291_v8  ;;  %v913_v19 = vmul.f32 %v2160_v1, %v528_v4  ;;  %v914_v20 = vmul.f32 %v2160_v1, %v529_v5  ;;  %1676 = vst [vmem:[%s2192_s24 + $0x9a8] sm:$0xff] %v1292_v12  ;;  %v1295_v23 = vadd.f32 %v2162_v2, %v910_v14  ;;  %v550_v8 = vld [vmem:[%s2153_s13 + $0xa88] sm:$0xff]  ;;  %v552_v14 = vld [vmem:[%s2153_s13 + $0xa98] sm:$0xff] }
 0x10c   : > { %1677 = vst [vmem:[%s2192_s24 + $0x9b0] sm:$0xff] %v1293_v13  ;;  %v1296_v24 = vadd.f32 %v2162_v2, %v911_v15  ;;  %v915_v25 = vmul.f32 %v2160_v1, %v530_v10  ;;  %v916_v26 = vmul.f32 %v2160_v1, %v531_v11  ;;  %1678 = vst [vmem:[%s2192_s24 + $0x9b8] sm:$0xff] %v1294_v17  ;;  %v551_v13 = vld [vmem:[%s2153_s13 + $0xa90] sm:$0xff]  ;;  %v553_v15 = vld [vmem:[%s2153_s13 + $0xaa0] sm:$0xff] }
 0x10d   : > { %v1297_v30 = vadd.f32 %v2162_v2, %v912_v18  ;;  %v1298_v31 = vadd.f32 %v2162_v2, %v913_v19  ;;  %v1299_v32 = vadd.f32 %v2162_v2, %v914_v20  ;;  %v917_v33 = vmul.f32 %v2160_v1, %v532_v16  ;;  %1679 = vst [vmem:[%s2192_s24 + $0x9c0] sm:$0xff] %v1295_v23  ;;  %v554_v20 = vld [vmem:[%s2153_s13 + $0xaa8] sm:$0xff] }
 0x10e   : > { %1680 = vst [vmem:[%s2192_s24 + $0x9c8] sm:$0xff] %v1296_v24  ;;  %v1300_v36 = vadd.f32 %v2162_v2, %v915_v25  ;;  %v1301_v37 = vadd.f32 %v2162_v2, %v916_v26  ;;  %v918_v38 = vmul.f32 %v2160_v1, %v533_v21  ;;  %v919_v39 = vmul.f32 %v2160_v1, %v534_v22  ;;  %v555_v21 = vld [vmem:[%s2153_s13 + $0xab0] sm:$0xff]  ;;  %v556_v26 = vld [vmem:[%s2153_s13 + $0xab8] sm:$0xff] }
 0x10f   : > { %1681 = vst [vmem:[%s2192_s24 + $0x9d0] sm:$0xff] %v1297_v30  ;;  %1682 = vst [vmem:[%s2192_s24 + $0x9d8] sm:$0xff] %v1298_v31  ;;  %v1302_v41 = vadd.f32 %v2162_v2, %v917_v33  ;;  %v920_v42 = vmul.f32 %v2160_v1, %v535_v27  ;;  %v921_v43 = vmul.f32 %v2160_v1, %v536_v28  ;;  %v557_v31 = vld [vmem:[%s2153_s13 + $0xac0] sm:$0xff] }
 0x110   : > { %1683 = vst [vmem:[%s2192_s24 + $0x9e0] sm:$0xff] %v1299_v32  ;;  %v922_v44 = vmul.f32 %v2160_v1, %v537_v29  ;;  %1684 = vst [vmem:[%s2192_s24 + $0x9e8] sm:$0xff] %v1300_v36  ;;  %v1303_v47 = vadd.f32 %v2162_v2, %v918_v38  ;;  %v1304_v48 = vadd.f32 %v2162_v2, %v919_v39  ;;  %v558_v32 = vld [vmem:[%s2153_s13 + $0xac8] sm:$0xff]  ;;  %v560_v38 = vld [vmem:[%s2153_s13 + $0xad8] sm:$0xff] }
 0x111   : > { %1685 = vst [vmem:[%s2192_s24 + $0x9f0] sm:$0xff] %v1301_v37  ;;  %v923_v49 = vmul.f32 %v2160_v1, %v538_v34  ;;  %v924_v50 = vmul.f32 %v2160_v1, %v539_v35  ;;  %1686 = vst [vmem:[%s2192_s24 + $0x9f8] sm:$0xff] %v1302_v41  ;;  %v1305_v54 = vadd.f32 %v2162_v2, %v920_v42  ;;  %v559_v37 = vld [vmem:[%s2153_s13 + $0xad0] sm:$0xff]  ;;  %v561_v39 = vld [vmem:[%s2153_s13 + $0xae0] sm:$0xff] }
 0x112   : > { %v1306_v55 = vadd.f32 %v2162_v2, %v921_v43  ;;  %v1307_v56 = vadd.f32 %v2162_v2, %v922_v44  ;;  %v925_v57 = vmul.f32 %v2160_v1, %v540_v40  ;;  %1687 = vst [vmem:[%s2192_s24 + $0xa00] sm:$0xff] %v1303_v47  ;;  %1688 = vst [vmem:[%s2192_s24 + $0xa08] sm:$0xff] %v1304_v48  ;;  %v562_v44 = vld [vmem:[%s2153_s13 + $0xae8] sm:$0xff] }
 0x113   : > { %v1308_v60 = vadd.f32 %v2162_v2, %v923_v49  ;;  %v1309_v61 = vadd.f32 %v2162_v2, %v924_v50  ;;  %v926_v62 = vmul.f32 %v2160_v1, %v541_v45  ;;  %v927_v63 = vmul.f32 %v2160_v1, %v542_v46  ;;  %1689 = vst [vmem:[%s2192_s24 + $0xa10] sm:$0xff] %v1305_v54  ;;  %v563_v45 = vld [vmem:[%s2153_s13 + $0xaf0] sm:$0xff]  ;;  %v564_v50 = vld [vmem:[%s2153_s13 + $0xaf8] sm:$0xff] }
 0x114   : > { %1690 = vst [vmem:[%s2192_s24 + $0xa18] sm:$0xff] %v1306_v55  ;;  %1691 = vst [vmem:[%s2192_s24 + $0xa20] sm:$0xff] %v1307_v56  ;;  %v1310_v3 = vadd.f32 %v2162_v2, %v925_v57  ;;  %v928_v4 = vmul.f32 %v2160_v1, %v543_v51  ;;  %v929_v5 = vmul.f32 %v2160_v1, %v544_v52  ;;  %v565_v55 = vld [vmem:[%s2153_s13 + $0xb00] sm:$0xff]  ;;  %v566_v56 = vld [vmem:[%s2153_s13 + $0xb08] sm:$0xff] }
 0x115   : > { %v930_v6 = vmul.f32 %v2160_v1, %v545_v53  ;;  %1692 = vst [vmem:[%s2192_s24 + $0xa28] sm:$0xff] %v1308_v60  ;;  %1693 = vst [vmem:[%s2192_s24 + $0xa30] sm:$0xff] %v1309_v61  ;;  %v1311_v9 = vadd.f32 %v2162_v2, %v926_v62  ;;  %v1312_v10 = vadd.f32 %v2162_v2, %v927_v63  ;;  %v567_v61 = vld [vmem:[%s2153_s13 + $0xb10] sm:$0xff]  ;;  %v568_v62 = vld [vmem:[%s2153_s13 + $0xb18] sm:$0xff] }
 0x116   : > { %v931_v11 = vmul.f32 %v2160_v1, %v546_v58  ;;  %v932_v12 = vmul.f32 %v2160_v1, %v547_v59  ;;  %1694 = vst [vmem:[%s2192_s24 + $0xa38] sm:$0xff] %v1310_v3  ;;  %v1313_v16 = vadd.f32 %v2162_v2, %v928_v4  ;;  %v1314_v17 = vadd.f32 %v2162_v2, %v929_v5  ;;  %v569_v63 = vld [vmem:[%s2153_s13 + $0xb20] sm:$0xff] }
 0x117   : > { %v1315_v18 = vadd.f32 %v2162_v2, %v930_v6  ;;  %v933_v19 = vmul.f32 %v2160_v1, %v548_v0  ;;  %1695 = vst [vmem:[%s2192_s24 + $0xa40] sm:$0xff] %v1311_v9  ;;  %1696 = vst [vmem:[%s2192_s24 + $0xa48] sm:$0xff] %v1312_v10  ;;  %v934_v24 = vmul.f32 %v2160_v1, %v549_v7  ;;  %v570_v6 = vld [vmem:[%s2153_s13 + $0xb28] sm:$0xff]  ;;  %v571_v7 = vld [vmem:[%s2153_s13 + $0xb30] sm:$0xff] }
 0x118   : > { %v1316_v22 = vadd.f32 %v2162_v2, %v931_v11  ;;  %v1317_v23 = vadd.f32 %v2162_v2, %v932_v12  ;;  %v935_v25 = vmul.f32 %v2160_v1, %v550_v8  ;;  %1697 = vst [vmem:[%s2192_s24 + $0xa50] sm:$0xff] %v1313_v16  ;;  %1698 = vst [vmem:[%s2192_s24 + $0xa58] sm:$0xff] %v1314_v17  ;;  %v572_v12 = vld [vmem:[%s2153_s13 + $0xb38] sm:$0xff]  ;;  %v573_v17 = vld [vmem:[%s2153_s13 + $0xb40] sm:$0xff] }
 0x119   : > { %1699 = vst [vmem:[%s2192_s24 + $0xa60] sm:$0xff] %v1315_v18  ;;  %v1318_v27 = vadd.f32 %v2162_v2, %v933_v19  ;;  %v936_v28 = vmul.f32 %v2160_v1, %v551_v13  ;;  %v937_v29 = vmul.f32 %v2160_v1, %v552_v14  ;;  %v938_v30 = vmul.f32 %v2160_v1, %v553_v15  ;;  %v574_v18 = vld [vmem:[%s2153_s13 + $0xb48] sm:$0xff] }
 0x11a   : > { %1700 = vst [vmem:[%s2192_s24 + $0xa68] sm:$0xff] %v1316_v22  ;;  %1701 = vst [vmem:[%s2192_s24 + $0xa70] sm:$0xff] %v1317_v23  ;;  %v1319_v33 = vadd.f32 %v2162_v2, %v934_v24  ;;  %v1320_v34 = vadd.f32 %v2162_v2, %v935_v25  ;;  %v939_v35 = vmul.f32 %v2160_v1, %v554_v20  ;;  %v575_v23 = vld [vmem:[%s2153_s13 + $0xb50] sm:$0xff]  ;;  %v576_v24 = vld [vmem:[%s2153_s13 + $0xb58] sm:$0xff] }
 0x11b   : > { %v940_v36 = vmul.f32 %v2160_v1, %v555_v21  ;;  %1702 = vst [vmem:[%s2192_s24 + $0xa78] sm:$0xff] %v1318_v27  ;;  %v1321_v40 = vadd.f32 %v2162_v2, %v936_v28  ;;  %v1322_v41 = vadd.f32 %v2162_v2, %v937_v29  ;;  %v1323_v42 = vadd.f32 %v2162_v2, %v938_v30  ;;  %v577_v25 = vld [vmem:[%s2153_s13 + $0xb60] sm:$0xff]  ;;  %v578_v30 = vld [vmem:[%s2153_s13 + $0xb68] sm:$0xff] }
 0x11c   : > { %v941_v43 = vmul.f32 %v2160_v1, %v556_v26  ;;  %1703 = vst [vmem:[%s2192_s24 + $0xa80] sm:$0xff] %v1319_v33  ;;  %1704 = vst [vmem:[%s2192_s24 + $0xa88] sm:$0xff] %v1320_v34  ;;  %v1324_v46 = vadd.f32 %v2162_v2, %v939_v35  ;;  %v942_v48 = vmul.f32 %v2160_v1, %v557_v31  ;;  %v579_v31 = vld [vmem:[%s2153_s13 + $0xb70] sm:$0xff] }
 0x11d   : > { %v1325_v47 = vadd.f32 %v2162_v2, %v940_v36  ;;  %v943_v49 = vmul.f32 %v2160_v1, %v558_v32  ;;  %1705 = vst [vmem:[%s2192_s24 + $0xa90] sm:$0xff] %v1321_v40  ;;  %1706 = vst [vmem:[%s2192_s24 + $0xa98] sm:$0xff] %v1322_v41  ;;  %v944_v52 = vmul.f32 %v2160_v1, %v559_v37  ;;  %v580_v36 = vld [vmem:[%s2153_s13 + $0xb78] sm:$0xff]  ;;  %v581_v41 = vld [vmem:[%s2153_s13 + $0xb80] sm:$0xff] }
 0x11e   : > { %1707 = vst [vmem:[%s2192_s24 + $0xaa0] sm:$0xff] %v1323_v42  ;;  %v1326_v51 = vadd.f32 %v2162_v2, %v941_v43  ;;  %v945_v53 = vmul.f32 %v2160_v1, %v560_v38  ;;  %v946_v54 = vmul.f32 %v2160_v1, %v561_v39  ;;  %1708 = vst [vmem:[%s2192_s24 + $0xaa8] sm:$0xff] %v1324_v46  ;;  %v582_v42 = vld [vmem:[%s2153_s13 + $0xb88] sm:$0xff] }
 0x11f   : > { %1709 = vst [vmem:[%s2192_s24 + $0xab0] sm:$0xff] %v1325_v47  ;;  %v1327_v57 = vadd.f32 %v2162_v2, %v942_v48  ;;  %v1328_v58 = vadd.f32 %v2162_v2, %v943_v49  ;;  %v947_v59 = vmul.f32 %v2160_v1, %v562_v44  ;;  %v948_v60 = vmul.f32 %v2160_v1, %v563_v45  ;;  %v583_v47 = vld [vmem:[%s2153_s13 + $0xb90] sm:$0xff]  ;;  %v584_v48 = vld [vmem:[%s2153_s13 + $0xb98] sm:$0xff]  ;;  %v585_v49 = vld [vmem:[%s2153_s13 + $0xba0] sm:$0xff] }
 0x120   : > { %1710 = vst [vmem:[%s2192_s24 + $0xab8] sm:$0xff] %v1326_v51  ;;  %v1329_v0 = vadd.f32 %v2162_v2, %v944_v52  ;;  %v1330_v3 = vadd.f32 %v2162_v2, %v945_v53  ;;  %v1331_v4 = vadd.f32 %v2162_v2, %v946_v54  ;;  %v949_v5 = vmul.f32 %v2160_v1, %v564_v50  ;;  %v586_v54 = vld [vmem:[%s2153_s13 + $0xba8] sm:$0xff] }
 0x121   : > { %1711 = vst [vmem:[%s2192_s24 + $0xac0] sm:$0xff] %v1327_v57  ;;  %1712 = vst [vmem:[%s2192_s24 + $0xac8] sm:$0xff] %v1328_v58  ;;  %v1332_v8 = vadd.f32 %v2162_v2, %v947_v59  ;;  %v1333_v9 = vadd.f32 %v2162_v2, %v948_v60  ;;  %v950_v10 = vmul.f32 %v2160_v1, %v565_v55  ;;  %v587_v55 = vld [vmem:[%s2153_s13 + $0xbb0] sm:$0xff]  ;;  %v588_v60 = vld [vmem:[%s2153_s13 + $0xbb8] sm:$0xff] }
 0x122   : > { %v951_v11 = vmul.f32 %v2160_v1, %v566_v56  ;;  %1713 = vst [vmem:[%s2192_s24 + $0xad0] sm:$0xff] %v1329_v0  ;;  %1714 = vst [vmem:[%s2192_s24 + $0xad8] sm:$0xff] %v1330_v3  ;;  %v1334_v13 = vadd.f32 %v2162_v2, %v949_v5  ;;  %v952_v14 = vmul.f32 %v2160_v1, %v567_v61  ;;  %v589_v3 = vld [vmem:[%s2153_s13 + $0xbc0] sm:$0xff] }
 0x123   : > { %1715 = vst [vmem:[%s2192_s24 + $0xae0] sm:$0xff] %v1331_v4  ;;  %v953_v15 = vmul.f32 %v2160_v1, %v568_v62  ;;  %v954_v16 = vmul.f32 %v2160_v1, %v569_v63  ;;  %1716 = vst [vmem:[%s2192_s24 + $0xae8] sm:$0xff] %v1332_v8  ;;  %v1335_v19 = vadd.f32 %v2162_v2, %v950_v10  ;;  %v590_v4 = vld [vmem:[%s2153_s13 + $0xbc8] sm:$0xff]  ;;  %v592_v10 = vld [vmem:[%s2153_s13 + $0xbd8] sm:$0xff] }
 0x124   : > { %1717 = vst [vmem:[%s2192_s24 + $0xaf0] sm:$0xff] %v1333_v9  ;;  %v1336_v20 = vadd.f32 %v2162_v2, %v951_v11  ;;  %v955_v21 = vmul.f32 %v2160_v1, %v570_v6  ;;  %v956_v22 = vmul.f32 %v2160_v1, %v571_v7  ;;  %1718 = vst [vmem:[%s2192_s24 + $0xaf8] sm:$0xff] %v1334_v13  ;;  %v591_v9 = vld [vmem:[%s2153_s13 + $0xbd0] sm:$0xff]  ;;  %v593_v11 = vld [vmem:[%s2153_s13 + $0xbe0] sm:$0xff] }
 0x125   : > { %v1337_v26 = vadd.f32 %v2162_v2, %v952_v14  ;;  %v1338_v27 = vadd.f32 %v2162_v2, %v953_v15  ;;  %v1339_v28 = vadd.f32 %v2162_v2, %v954_v16  ;;  %v957_v29 = vmul.f32 %v2160_v1, %v572_v12  ;;  %1719 = vst [vmem:[%s2192_s24 + $0xb00] sm:$0xff] %v1335_v19  ;;  %v594_v16 = vld [vmem:[%s2153_s13 + $0xbe8] sm:$0xff] }
 0x126   : > { %1720 = vst [vmem:[%s2192_s24 + $0xb08] sm:$0xff] %v1336_v20  ;;  %v1340_v32 = vadd.f32 %v2162_v2, %v955_v21  ;;  %v1341_v33 = vadd.f32 %v2162_v2, %v956_v22  ;;  %v958_v34 = vmul.f32 %v2160_v1, %v573_v17  ;;  %v959_v35 = vmul.f32 %v2160_v1, %v574_v18  ;;  %v595_v17 = vld [vmem:[%s2153_s13 + $0xbf0] sm:$0xff]  ;;  %v596_v22 = vld [vmem:[%s2153_s13 + $0xbf8] sm:$0xff] }
 0x127   : > { %1721 = vst [vmem:[%s2192_s24 + $0xb10] sm:$0xff] %v1337_v26  ;;  %1722 = vst [vmem:[%s2192_s24 + $0xb18] sm:$0xff] %v1338_v27  ;;  %v1342_v37 = vadd.f32 %v2162_v2, %v957_v29  ;;  %v960_v38 = vmul.f32 %v2160_v1, %v575_v23  ;;  %v961_v39 = vmul.f32 %v2160_v1, %v576_v24 }
 0x128   : > { %1723 = vst [vmem:[%s2192_s24 + $0xb20] sm:$0xff] %v1339_v28  ;;  %v962_v40 = vmul.f32 %v2160_v1, %v577_v25  ;;  %1724 = vst [vmem:[%s2192_s24 + $0xb28] sm:$0xff] %v1340_v32  ;;  %v1343_v43 = vadd.f32 %v2162_v2, %v958_v34  ;;  %v1344_v44 = vadd.f32 %v2162_v2, %v959_v35 }
 0x129   : > { %1725 = vst [vmem:[%s2192_s24 + $0xb30] sm:$0xff] %v1341_v33  ;;  %v963_v45 = vmul.f32 %v2160_v1, %v578_v30  ;;  %v964_v46 = vmul.f32 %v2160_v1, %v579_v31  ;;  %1726 = vst [vmem:[%s2192_s24 + $0xb38] sm:$0xff] %v1342_v37  ;;  %v1345_v50 = vadd.f32 %v2162_v2, %v960_v38 }
 0x12a   : > { %v1346_v51 = vadd.f32 %v2162_v2, %v961_v39  ;;  %v1347_v52 = vadd.f32 %v2162_v2, %v962_v40  ;;  %v965_v53 = vmul.f32 %v2160_v1, %v580_v36  ;;  %1727 = vst [vmem:[%s2192_s24 + $0xb40] sm:$0xff] %v1343_v43  ;;  %1728 = vst [vmem:[%s2192_s24 + $0xb48] sm:$0xff] %v1344_v44 }
 0x12b   : > { %v1348_v56 = vadd.f32 %v2162_v2, %v963_v45  ;;  %v1349_v57 = vadd.f32 %v2162_v2, %v964_v46  ;;  %v966_v58 = vmul.f32 %v2160_v1, %v581_v41  ;;  %v967_v59 = vmul.f32 %v2160_v1, %v582_v42  ;;  %1729 = vst [vmem:[%s2192_s24 + $0xb50] sm:$0xff] %v1345_v50 }
 0x12c   : > { %1730 = vst [vmem:[%s2192_s24 + $0xb58] sm:$0xff] %v1346_v51  ;;  %1731 = vst [vmem:[%s2192_s24 + $0xb60] sm:$0xff] %v1347_v52  ;;  %v1350_v61 = vadd.f32 %v2162_v2, %v965_v53  ;;  %v968_v62 = vmul.f32 %v2160_v1, %v583_v47  ;;  %v969_v63 = vmul.f32 %v2160_v1, %v584_v48 }
 0x12d   : > { %v970_v0 = vmul.f32 %v2160_v1, %v585_v49  ;;  %1732 = vst [vmem:[%s2192_s24 + $0xb68] sm:$0xff] %v1348_v56  ;;  %1733 = vst [vmem:[%s2192_s24 + $0xb70] sm:$0xff] %v1349_v57  ;;  %v1351_v5 = vadd.f32 %v2162_v2, %v966_v58  ;;  %v1352_v6 = vadd.f32 %v2162_v2, %v967_v59 }
 0x12e   : > { %v971_v7 = vmul.f32 %v2160_v1, %v586_v54  ;;  %v972_v8 = vmul.f32 %v2160_v1, %v587_v55  ;;  %1734 = vst [vmem:[%s2192_s24 + $0xb78] sm:$0xff] %v1350_v61  ;;  %v1353_v12 = vadd.f32 %v2162_v2, %v968_v62  ;;  %v1354_v13 = vadd.f32 %v2162_v2, %v969_v63 }
 0x12f   : > { %v1355_v14 = vadd.f32 %v2162_v2, %v970_v0  ;;  %v973_v15 = vmul.f32 %v2160_v1, %v588_v60  ;;  %1735 = vst [vmem:[%s2192_s24 + $0xb80] sm:$0xff] %v1351_v5  ;;  %1736 = vst [vmem:[%s2192_s24 + $0xb88] sm:$0xff] %v1352_v6  ;;  %v974_v20 = vmul.f32 %v2160_v1, %v589_v3 }
 0x130   : > { %v1356_v18 = vadd.f32 %v2162_v2, %v971_v7  ;;  %v1357_v19 = vadd.f32 %v2162_v2, %v972_v8  ;;  %v975_v21 = vmul.f32 %v2160_v1, %v590_v4  ;;  %1737 = vst [vmem:[%s2192_s24 + $0xb90] sm:$0xff] %v1353_v12  ;;  %1738 = vst [vmem:[%s2192_s24 + $0xb98] sm:$0xff] %v1354_v13 }
 0x131   : > { %1739 = vst [vmem:[%s2192_s24 + $0xba0] sm:$0xff] %v1355_v14  ;;  %v1358_v23 = vadd.f32 %v2162_v2, %v973_v15  ;;  %v976_v24 = vmul.f32 %v2160_v1, %v591_v9  ;;  %v977_v25 = vmul.f32 %v2160_v1, %v592_v10  ;;  %v978_v26 = vmul.f32 %v2160_v1, %v593_v11 }
 0x132   : > { %1740 = vst [vmem:[%s2192_s24 + $0xba8] sm:$0xff] %v1356_v18  ;;  %1741 = vst [vmem:[%s2192_s24 + $0xbb0] sm:$0xff] %v1357_v19  ;;  %v1359_v27 = vadd.f32 %v2162_v2, %v974_v20  ;;  %v1360_v28 = vadd.f32 %v2162_v2, %v975_v21  ;;  %v979_v29 = vmul.f32 %v2160_v1, %v594_v16  ;;  %1758 = sbr.rel (!%p2091_p9) target bundleno = 341 (0x155), region = 40 }
 0x133   : > { %v980_v30 = vmul.f32 %v2160_v1, %v595_v17  ;;  %1742 = vst [vmem:[%s2192_s24 + $0xbb8] sm:$0xff] %v1358_v23  ;;  %v1361_v31 = vadd.f32 %v2162_v2, %v976_v24  ;;  %v1362_v32 = vadd.f32 %v2162_v2, %v977_v25  ;;  %v1363_v33 = vadd.f32 %v2162_v2, %v978_v26 }
 0x134   : > { %v981_v34 = vmul.f32 %v2160_v1, %v596_v22  ;;  %1743 = vst [vmem:[%s2192_s24 + $0xbc0] sm:$0xff] %v1359_v27  ;;  %1744 = vst [vmem:[%s2192_s24 + $0xbc8] sm:$0xff] %v1360_v28  ;;  %v1364_v35 = vadd.f32 %v2162_v2, %v979_v29 }
 0x135   : > { %v1365_v36 = vadd.f32 %v2162_v2, %v980_v30  ;;  %1745 = vst [vmem:[%s2192_s24 + $0xbd0] sm:$0xff] %v1361_v31  ;;  %1746 = vst [vmem:[%s2192_s24 + $0xbd8] sm:$0xff] %v1362_v32 }
 0x136   : > { %1747 = vst [vmem:[%s2192_s24 + $0xbe0] sm:$0xff] %v1363_v33  ;;  %v1366_v37 = vadd.f32 %v2162_v2, %v981_v34  ;;  %1748 = vst [vmem:[%s2192_s24 + $0xbe8] sm:$0xff] %v1364_v35 }
 0x137   : > { %1749 = vst [vmem:[%s2192_s24 + $0xbf0] sm:$0xff] %v1365_v36 }
 0x138   : > { %1750 = vst [vmem:[%s2192_s24 + $0xbf8] sm:$0xff] %v1366_v37 }
 0x139   : > { %s3783_s14 = smov (!%p1761_p6, %s1760_s14), 24 }
 0x13a   : > { %s3707_s15 = sshll.u32 %s3783_s14, 11 }
 0x13b   : > { %s1766_s1 = ssub.s32 49152, %s3707_s15 }
 0x13c   : > { %1767 = vsyncadd %s1752_s9, %s1766_s1  ;;  %p1859_p10 = scmp.ne.s32.totalorder %s3707_s15, 0  ;;  %s1873_s25 = smul.u32 49152, %s2068_s0 }
 0x13d   : > { %s1773_s21 = sshll.u32 %s2192_s24, 4  ;;  %s2018_s30 = smov [#allocation7]   ;;  %s3720_s21 = int_to_ptr.vmem [resolvable:$true] %s1773_s21 }
 0x13e   : > { %s3718_s28 = scalar_lea.hbm %s3769_s3, %s1873_s25  ;;  %s1947_s29 = scalar_lea.vmem %s3720_s21, %s3707_s15 }
 0x13f   : > { %p1948_p9 = scmp.ne.s32.totalorder %s3720_s21, %s1947_s29  ;;  %s1951_s5 = sshll.u32 %s2018_s30, 4  ;;  %s1952_s5 = int_to_ptr.vmem [resolvable:$false] %s1951_s5 }
 0x140   : > { %s1953_s0 = scalar_lea.vmem %s1952_s5, 98304  ;;  %p1954_p12 = scmp.lt.s32.totalorder %s3720_s21, %s1952_s5 }
 0x141   : > { %p1949_p11 = pnand %p1948_p9, %p1859_p10  ;;  %p1955_p0 = scmp.lt.s32.totalorder %s1953_s0, %s1947_s29 }
 0x143   : > { %p1950_p13 = pneg %p1949_p11  ;;  %p1956_p1 = por %p1955_p0, %p1954_p12 }
 0x145   : > { %p1957_p3 = pnand %p1956_p1, %p1950_p13 }
 0x147   : > { %1960 = shalt.err (!%p1957_p3)
}
 0x148   : > { %s1961_s7 = scalar_lea.hbm %s3718_s28, %s3707_s15  ;;  %s1965_s13 = scalar_lea.hbm %s3769_s3, 92160 }
 0x149   : > { %p1962_p4 = scmp.ne.s32.totalorder %s3718_s28, %s1961_s7  ;;  %p1966_p7 = scmp.lt.u32.totalorder %s3718_s28, %s3769_s3 }
 0x14a   : > { %p1967_p8 = scmp.lt.u32.totalorder %s1965_s13, %s1961_s7  ;;  %p1969_p9 = scmp.lt.u32.totalorder %s1961_s7, %s3718_s28 }
 0x14b   : > { %p1963_p5 = pnand %p1962_p4, %p1859_p10 }
 0x14c   : > { %p1968_p6 = por %p1967_p8, %p1966_p7 }
 0x14d   : > { %p1964_p2 = pneg %p1963_p5 }
 0x14e   : > { %p1970_p11 = por %p1969_p9, %p1968_p6 }
 0x150   : > { %p1971_p13 = pnand %p1970_p11, %p1964_p2 }
 0x152   : > { %1974 = shalt.err (!%p1971_p13)
}
 0x153   : > { %s2019_s24 = smov 2048   ;;  %s2020_s12 = smov 128  }
 0x154   : > { %1779 = dma.vmem_to_hbm [thread:$0]  (%p1859_p10), %s3720_s21, %s3707_s15, %s3718_s28, %s1752_s9, %s2019_s24, %s2019_s24, %s2020_s12  }
 0x155 PF: > { %s1788_s14 = sand.u32 1, %s2001_s16   ;;  %p3774_p12 = scmp.ne.s32.totalorder %s3773_s26, 0 }
 0x156   : > { %p3775_p0 = scmp.ge.s32.totalorder %s2013_s19, 2  ;;  %s1789_s1 = scalar_lea.sflag [#allocation6], %s1788_s14 }
 0x158   : > { %p1879_p1 = pnand %p3775_p0, %p3774_p12 }
 0x15a   : > { %1996 = dma.done.wait (!%p1879_p1), %s1789_s1, 49152  }
 0x15b   : > { %1998 = vsyncadd (!%p1879_p1), %s1789_s1, 4294918144  ;;  %p18_p3 = scmp.ge.s32.totalorder %s2072_s20, 4   ;;  %s3776_s16 = smov %s2005_s17 }
 0x15c   : > { %s3777_s17 = smov %s2009_s18  ;;  %s3778_s18 = smov %s2084_s23 }
 0x15d   : > { %s3779_s19 = smov %s2072_s20  ;;  %20 = sbr.rel (!%p18_p3) target bundleno = 8 (0x8), region = 77 }
 0x164   :  { %1794 = vsyncpa [#allocation5], 1 }
 0x165   :  { %1796 = vsyncpa [#allocation5 + $0x1], 1 }
 0x166   :  { %1797 = vsyncpa [#allocation6], 1 }
 0x167   :  { %1799 = vsyncpa [#allocation6 + $0x1], 1 }

</bundles_post_ra>
